<compile_context>
chip_gen: v6e
topology: v6e:2x2x1
jax: 0.10.0
libtpu: 0.0.40
codegen_flags: <defaults>
</compile_context>

<pallas_src>
import jax
import jax.numpy as jnp
from jax.experimental import pallas as pl
from jax.experimental.pallas import tpu as pltpu


# ----------------------------------------------------------------------------- kernel
def _distill_lstm_kernel(
    tile_max_ref,      # SMEM (n_tiles,) i32 : per-batch-tile max length (scalar prefetch)
    x_ref,             # (T, TB, E)  bf16 : time-major embedded tokens (this batch tile)
    lens_ref,          # (TB, 1)     i32  : per-row sequence lengths (mask_idx)
    g0_ref, b0_ref,    # (1, E)      f32  : LayerNorm norm0 affine
    wihc_ref,          # (E, 4S)     bf16 : fused fwd|bwd input-projection weight
    bc_ref,            # (1, 4S)     f32  : fused fwd|bwd input-projection bias
    whhc_ref,          # (S, 4S)     bf16 : block-diagonal fwd|bwd recurrent weight
    g1_ref, b1_ref,    # (1, 2H)     f32  : LayerNorm norm1 affine
    fcw_ref,           # (2H, NP)    bf16 : fc1 weight (lane-padded)
    fcb_ref,           # (1, NP)     f32  : fc1 bias (lane-padded)
    out_ref,           # (TB, NP)    f32
    gx_scr,            # (T, TB, 4S) bf16 VMEM : precomputed fused input projections
    mask_scr,          # (T, TB, 1)  f32  VMEM : per-(t,row) validity mask
):
    T, TB, E = x_ref.shape
    S = whhc_ref.shape[0]            # packed state width: fwd lanes [0:H], bwd [H:2H]
    H = g1_ref.shape[1] // 2         # real hidden size per direction

    # --- embedding post-processing: relu -> LayerNorm(norm0), all f32 ----------
    x = jnp.maximum(x_ref[...].astype(jnp.float32), 0.0)
    mu = jnp.mean(x, axis=-1, keepdims=True)
    var = jnp.mean(jnp.square(x - mu), axis=-1, keepdims=True)
    xn = (x - mu) * jax.lax.rsqrt(var + 1e-5) * g0_ref[...] + b0_ref[...]

    # --- fused (fwd|bwd) input projection: ONE MXU matmul over all timesteps ---
    xn2 = xn.reshape(T * TB, E).astype(jnp.bfloat16)
    gx = jnp.dot(xn2, wihc_ref[...], preferred_element_type=jnp.float32) + bc_ref[...]
    gx_scr[...] = gx.astype(jnp.bfloat16).reshape(T, TB, 4 * S)

    # --- validity mask, computed once (pack_padded_sequence semantics) ---------
    lens = lens_ref[...]                                        # (TB, 1) i32
    t_iota = jax.lax.broadcasted_iota(jnp.int32, (T, TB, 1), 0)
    mask_scr[...] = (t_iota < lens[None, :, :]).astype(jnp.float32)

    # lane selectors: fwd chain owns lanes [0:H] of every slab, bwd owns [H:2H];
    # pad lanes [2H:S] have zero weights/bias so they stay exactly zero.
    state_sel = jax.lax.broadcasted_iota(jnp.int32, (1, S), 1) < H      # (1, S)
    gate_sel = jnp.concatenate([state_sel] * 4, axis=1)                 # (1, 4S)

    whh = whhc_ref[...]                          # (S, 4S) bf16, loop invariant
    max_len = tile_max_ref[pl.program_id(0)]     # dynamic trip count for this tile

    def body(t, carry):
        h, c = carry
        tb = max_len - 1 - t                     # bwd chain walks valid steps in reverse
        # fwd lanes take timestep t, bwd lanes take timestep max_len-1-t
        gx_t = jnp.where(gate_sel, gx_scr[t], gx_scr[tb]).astype(jnp.float32)
        m = jnp.where(state_sel, mask_scr[t], mask_scr[tb])              # (TB, S)
        gates = jnp.dot(h.astype(jnp.bfloat16), whh,
                        preferred_element_type=jnp.float32) + gx_t       # (TB, 4S)
        i_g = jax.nn.sigmoid(gates[:, 0 * S:1 * S])
        f_g = jax.nn.sigmoid(gates[:, 1 * S:2 * S])
        g_g = jnp.tanh(gates[:, 2 * S:3 * S])
        o_g = jax.nn.sigmoid(gates[:, 3 * S:4 * S])
        c_new = f_g * c + i_g * g_g
        h_new = o_g * jnp.tanh(c_new)
        # frozen-state blend: once a chain passes a row's length its state stops
        h = h + m * (h_new - h)
        c = c + m * (c_new - c)
        return h, c

    h0 = jnp.zeros((TB, S), jnp.float32)
    c0 = jnp.zeros((TB, S), jnp.float32)
    # Dynamic bound: padded timesteps (and the whole pure-padding tile, where
    # max_len == 0) are skipped entirely.
    h, _ = jax.lax.fori_loop(0, max_len, body, (h0, c0))

    # --- concat(h_fwd, h_bwd) is just the first 2H packed lanes ----------------
    hcat = h[:, :2 * H]                                          # (TB, 2H)
    mu1 = jnp.mean(hcat, axis=-1, keepdims=True)
    var1 = jnp.mean(jnp.square(hcat - mu1), axis=-1, keepdims=True)
    hn = (hcat - mu1) * jax.lax.rsqrt(var1 + 1e-5) * g1_ref[...] + b1_ref[...]
    # NOTE: pure-padding rows LayerNorm an all-zero vector (var=0, rsqrt(1e-5));
    # the result is finite and sliced away by the wrapper.
    out_ref[...] = (jnp.dot(hn.astype(jnp.bfloat16), fcw_ref[...],
                            preferred_element_type=jnp.float32) + fcb_ref[...])


# ----------------------------------------------------------------------------- wrapper
def _round_up(n, m):
    return ((n + m - 1) // m) * m


def _pack_gate_cols(w_f, w_b, h, s):
    """(rows,4h) x2 -> (rows,4s): for each PyTorch gate slab (i,f,g,o) the fwd
    direction goes to lanes [0:h] and the bwd direction to lanes [h:2h] of a
    lane-aligned slab of width s; remaining lanes are zero (exact numerics)."""
    rows = w_f.shape[0]
    out = jnp.zeros((rows, 4 * s), jnp.float32)
    for g in range(4):
        out = out.at[:, g * s:g * s + h].set(w_f[:, g * h:(g + 1) * h])
        out = out.at[:, g * s + h:g * s + 2 * h].set(w_b[:, g * h:(g + 1) * h])
    return out


def _pack_whh(whh_f, whh_b, h, s):
    """Block-diagonal recurrent weight: fwd state rows feed only fwd gate lanes,
    bwd state rows feed only bwd gate lanes -> one matmul advances both chains."""
    out = jnp.zeros((s, 4 * s), jnp.float32)
    for g in range(4):
        out = out.at[:h, g * s:g * s + h].set(whh_f[:, g * h:(g + 1) * h])
        out = out.at[h:2 * h, g * s + h:g * s + 2 * h].set(whh_b[:, g * h:(g + 1) * h])
    return out


def distill_lstm_forward(x_tokens, mask_idx, params, batch_tile=None):
    B, T = x_tokens.shape
    E = params["emb"].shape[1]
    H = params["whh_f"].shape[0]
    NOUT = params["fcw"].shape[1]

    # packed bidirectional state width (fwd lanes [0:H], bwd lanes [H:2H]).
    # TODO(synk): for H >= 128 a split-chain layout (one aligned slab per
    # direction) would be preferable to this packing.
    S = _round_up(2 * H, 128)
    NP = _round_up(NOUT, 128)                 # lane-dense output store

    # batch tiling: fill the MXU M-dim and keep >= 2 grid programs (v7x 2 TCs).
    if batch_tile is None:
        batch_tile = min(64, _round_up(B, 8))
    TB = batch_tile
    BP = _round_up(B, TB)
    if BP // TB < 2:
        BP = 2 * TB                           # extra tile is pure padding (max_len=0)
    n_tiles = BP // TB

    # --- glue (XLA): embedding gather straight into time-major bf16 layout -----
    x_tbe = params["emb"][x_tokens.T].astype(jnp.bfloat16)       # (T, B, E)
    if BP > B:
        x_tbe = jnp.pad(x_tbe, ((0, 0), (0, BP - B), (0, 0)))
    lens_full = jnp.zeros((BP,), jnp.int32).at[:B].set(mask_idx.astype(jnp.int32))
    lens = lens_full.reshape(BP, 1)
    tile_max = jnp.max(lens_full.reshape(n_tiles, TB), axis=1).astype(jnp.int32)

    # --- weight packing/padding (zeros -> real lanes numerically unchanged) ----
    wih_c = _pack_gate_cols(params["wih_f"], params["wih_b"], H, S).astype(jnp.bfloat16)
    b_c = _pack_gate_cols(params["b_f"], params["b_b"], H, S)            # f32
    whh_c = _pack_whh(params["whh_f"], params["whh_b"], H, S).astype(jnp.bfloat16)
    fcw = (jnp.zeros((2 * H, NP), jnp.float32)
           .at[:, :NOUT].set(params["fcw"]).astype(jnp.bfloat16))
    fcb = jnp.zeros((1, NP), jnp.float32).at[:, :NOUT].set(params["fcb"])

    weight_args = (params["g0"], params["b0"], wih_c, b_c, whh_c,
                   params["g1"], params["b1"], fcw, fcb)

    def _full_spec(shape):
        zeros = (0,) * len(shape)
        return pl.BlockSpec(shape, lambda i, tm, _z=zeros: _z)

    in_specs = [
        pl.BlockSpec((T, TB, E), lambda i, tm: (0, i, 0)),       # x (batch-tiled)
        pl.BlockSpec((TB, 1), lambda i, tm: (i, 0)),             # lens (batch-tiled)
    ] + [_full_spec(a.shape) for a in weight_args]               # weights: resident

    grid_spec = pltpu.PrefetchScalarGridSpec(
        num_scalar_prefetch=1,                                   # tile_max -> SMEM
        grid=(n_tiles,),
        in_specs=in_specs,
        out_specs=pl.BlockSpec((TB, NP), lambda i, tm: (i, 0)),
        scratch_shapes=[
            pltpu.VMEM((T, TB, 4 * S), jnp.bfloat16),            # fused x-projections
            pltpu.VMEM((T, TB, 1), jnp.float32),                 # validity mask
        ],
    )

    out = pl.pallas_call(
        _distill_lstm_kernel,
        out_shape=jax.ShapeDtypeStruct((BP, NP), jnp.float32),
        grid_spec=grid_spec,
        compiler_params=pltpu.CompilerParams(
            dimension_semantics=("parallel",),                   # 2 TCs on v7x
            # fits every generation's scoped budget at these shapes; re-budget
            # (and time-chunk the gx scratch) for long T / TB=64 on v7x's 64 MiB
            vmem_limit_bytes=32 * 1024 * 1024,
        ),
    )(tile_max, x_tbe, lens, *weight_args)
    return out[:B, :NOUT]


# ----------------------------------------------------------------------------- pure-JAX reference
def reference_forward(x_tokens, mask_idx, p):
    B, T = x_tokens.shape
    H = p["whh_f"].shape[0]
    x = jnp.maximum(p["emb"][x_tokens].astype(jnp.float32), 0.0)
    mu = x.mean(-1, keepdims=True)
    var = ((x - mu) ** 2).mean(-1, keepdims=True)
    xn = (x - mu) * jax.lax.rsqrt(var + 1e-5) * p["g0"] + p["b0"]
    mask = (jnp.arange(T)[None, :] < mask_idx[:, None]).astype(jnp.float32)
    xn = xn * mask[:, :, None]

    def cell(x_t, h, c, m_t, wih, whh, b):
        gates = x_t @ wih + h @ whh + b
        i = jax.nn.sigmoid(gates[:, :H]); f = jax.nn.sigmoid(gates[:, H:2 * H])
        g = jnp.tanh(gates[:, 2 * H:3 * H]); o = jax.nn.sigmoid(gates[:, 3 * H:])
        c_n = f * c + i * g
        h_n = o * jnp.tanh(c_n)
        return m_t * h_n + (1 - m_t) * h, m_t * c_n + (1 - m_t) * c

    h = jnp.zeros((B, H)); c = jnp.zeros((B, H))
    for t in range(T):
        h, c = cell(xn[:, t], h, c, mask[:, t:t + 1], p["wih_f"], p["whh_f"], p["b_f"])
    h_f = h
    h = jnp.zeros((B, H)); c = jnp.zeros((B, H))
    for t in range(T - 1, -1, -1):
        h, c = cell(xn[:, t], h, c, mask[:, t:t + 1], p["wih_b"], p["whh_b"], p["b_b"])
    h_b = h
    hc = jnp.concatenate([h_f, h_b], axis=1)
    mu1 = hc.mean(-1, keepdims=True)
    var1 = ((hc - mu1) ** 2).mean(-1, keepdims=True)
    hn = (hc - mu1) * jax.lax.rsqrt(var1 + 1e-5) * p["g1"] + p["b1"]
    return hn @ p["fcw"] + p["fcb"]


# ----------------------------------------------------------------------------- main
if __name__ == "__main__":
    B, T, E, H, NOUT, VOCAB = 2, 8, 32, 32, 4, 64

    key = jax.random.PRNGKey(0)
    ks = jax.random.split(key, 16)
    s = float(H) ** -0.5

    def u(k, shape, scale):
        return jax.random.uniform(k, shape, jnp.float32, -1.0, 1.0) * scale

    params = {
        "emb":   jax.random.normal(ks[0], (VOCAB, E), jnp.float32) * 0.5,
        "g0":    1.0 + 0.1 * jax.random.normal(ks[1], (1, E), jnp.float32),
        "b0":    0.1 * jax.random.normal(ks[2], (1, E), jnp.float32),
        "wih_f": u(ks[3], (E, 4 * H), s),
        "whh_f": u(ks[4], (H, 4 * H), s),
        "b_f":   u(ks[5], (1, 4 * H), s),
        "wih_b": u(ks[6], (E, 4 * H), s),
        "whh_b": u(ks[7], (H, 4 * H), s),
        "b_b":   u(ks[8], (1, 4 * H), s),
        "g1":    1.0 + 0.1 * jax.random.normal(ks[9], (1, 2 * H), jnp.float32),
        "b1":    0.1 * jax.random.normal(ks[10], (1, 2 * H), jnp.float32),
        "fcw":   u(ks[11], (2 * H, NOUT), float(2 * H) ** -0.5),
        "fcb":   0.05 * jax.random.normal(ks[12], (1, NOUT), jnp.float32),
    }

    x_tokens = jax.random.randint(ks[13], (B, T), 0, VOCAB, dtype=jnp.int32)
    mask_idx = jnp.array([T, T - 3], dtype=jnp.int32)   # variable lengths, max == T

    out = distill_lstm_forward(x_tokens, mask_idx, params)
    out = jax.block_until_ready(out)

    ref = reference_forward(x_tokens, mask_idx, params)
    assert out.shape == (B, NOUT)
    assert bool(jnp.all(jnp.isfinite(out)))
    max_diff = float(jnp.max(jnp.abs(out - ref)))
    # bf16 MXU operands (f32 accumulation) vs. the all-f32 reference: allow a
    # slightly looser absolute tolerance than the pure-f32 kernel needed.
    assert max_diff < 3e-2, f"mismatch vs reference, max diff {max_diff}"

    print("KERNEL_OK")
</pallas_src>

<mosaic_0001>
module attributes {stable_mosaic.version = 11 : i64} {
  func.func @_distill_lstm_kernel(%arg0: i32, %arg1: memref<2xi32, #tpu.memory_space<smem>>, %arg2: memref<8x8x32xbf16, #tpu.memory_space<vmem>>, %arg3: memref<8x1xi32, #tpu.memory_space<vmem>>, %arg4: memref<1x32xf32, #tpu.memory_space<vmem>>, %arg5: memref<1x32xf32, #tpu.memory_space<vmem>>, %arg6: memref<32x512xbf16, #tpu.memory_space<vmem>>, %arg7: memref<1x512xf32, #tpu.memory_space<vmem>>, %arg8: memref<128x512xbf16, #tpu.memory_space<vmem>>, %arg9: memref<1x64xf32, #tpu.memory_space<vmem>>, %arg10: memref<1x64xf32, #tpu.memory_space<vmem>>, %arg11: memref<64x128xbf16, #tpu.memory_space<vmem>>, %arg12: memref<1x128xf32, #tpu.memory_space<vmem>>, %arg13: memref<8x128xf32, #tpu.memory_space<vmem>>, %arg14: memref<8x8x512xbf16, #tpu.memory_space<vmem>>, %arg15: memref<8x8x1xf32, #tpu.memory_space<vmem>>) attributes {dimension_semantics = [#tpu.dimension_semantics<parallel>], iteration_bounds = array<i64: 2>, scalar_prefetch = 1 : i64, scratch_operands = 2 : i64, tpu.core_type = #tpu.core_type<tc>, window_params = [{transform_indices = @transform_0, window_bounds = array<i64: 8, 8, 32>}, {transform_indices = @transform_1, window_bounds = array<i64: 8, 1>}, {pipeline_mode = #tpu.pipeline_mode<synchronous>, transform_indices = @transform_2, window_bounds = array<i64: 1, 32>}, {pipeline_mode = #tpu.pipeline_mode<synchronous>, transform_indices = @transform_3, window_bounds = array<i64: 1, 32>}, {pipeline_mode = #tpu.pipeline_mode<synchronous>, transform_indices = @transform_4, window_bounds = array<i64: 32, 512>}, {pipeline_mode = #tpu.pipeline_mode<synchronous>, transform_indices = @transform_5, window_bounds = array<i64: 1, 512>}, {pipeline_mode = #tpu.pipeline_mode<synchronous>, transform_indices = @transform_6, window_bounds = array<i64: 128, 512>}, {pipeline_mode = #tpu.pipeline_mode<synchronous>, transform_indices = @transform_7, window_bounds = array<i64: 1, 64>}, {pipeline_mode = #tpu.pipeline_mode<synchronous>, transform_indices = @transform_8, window_bounds = array<i64: 1, 64>}, {pipeline_mode = #tpu.pipeline_mode<synchronous>, transform_indices = @transform_9, window_bounds = array<i64: 64, 128>}, {pipeline_mode = #tpu.pipeline_mode<synchronous>, transform_indices = @transform_10, window_bounds = array<i64: 1, 128>}, {transform_indices = @transform_11, window_bounds = array<i64: 8, 128>}]} {
    %c0 = arith.constant 0 : index
    %c0_0 = arith.constant 0 : index
    %c0_1 = arith.constant 0 : index
    %0 = vector.load %arg2[%c0, %c0_0, %c0_1] : memref<8x8x32xbf16, #tpu.memory_space<vmem>>, vector<8x8x32xbf16>
    %1 = arith.extf %0 : vector<8x8x32xbf16> to vector<8x8x32xf32>
    %cst = arith.constant 0.000000e+00 : f32
    %2 = vector.broadcast %cst : f32 to vector<8x8x32xf32>
    %3 = arith.maximumf %1, %2 : vector<8x8x32xf32>
    %cst_2 = arith.constant dense<0.000000e+00> : vector<8x8xf32>
    %4 = vector.multi_reduction <add>, %3, %cst_2 [2] : vector<8x8x32xf32> to vector<8x8xf32>
    %5 = vector.shape_cast %4 : vector<8x8xf32> to vector<8x8x1xf32>
    %cst_3 = arith.constant 3.200000e+01 : f32
    %6 = vector.broadcast %cst_3 : f32 to vector<8x8x1xf32>
    %7 = arith.divf %5, %6 : vector<8x8x1xf32>
    %8 = vector.broadcast %7 : vector<8x8x1xf32> to vector<8x8x32xf32>
    %9 = arith.subf %3, %8 : vector<8x8x32xf32>
    %10 = arith.mulf %9, %9 : vector<8x8x32xf32>
    %cst_4 = arith.constant dense<0.000000e+00> : vector<8x8xf32>
    %11 = vector.multi_reduction <add>, %10, %cst_4 [2] : vector<8x8x32xf32> to vector<8x8xf32>
    %12 = vector.shape_cast %11 : vector<8x8xf32> to vector<8x8x1xf32>
    %cst_5 = arith.constant 3.200000e+01 : f32
    %13 = vector.broadcast %cst_5 : f32 to vector<8x8x1xf32>
    %14 = arith.divf %12, %13 : vector<8x8x1xf32>
    %15 = vector.broadcast %7 : vector<8x8x1xf32> to vector<8x8x32xf32>
    %16 = arith.subf %3, %15 : vector<8x8x32xf32>
    %cst_6 = arith.constant 9.99999974E-6 : f32
    %17 = vector.broadcast %cst_6 : f32 to vector<8x8x1xf32>
    %18 = arith.addf %14, %17 : vector<8x8x1xf32>
    %19 = math.rsqrt %18 : vector<8x8x1xf32>
    %20 = vector.broadcast %19 : vector<8x8x1xf32> to vector<8x8x32xf32>
    %21 = arith.mulf %16, %20 : vector<8x8x32xf32>
    %c0_7 = arith.constant 0 : index
    %c0_8 = arith.constant 0 : index
    %22 = vector.load %arg4[%c0_7, %c0_8] : memref<1x32xf32, #tpu.memory_space<vmem>>, vector<1x32xf32>
    %23 = vector.shape_cast %22 : vector<1x32xf32> to vector<1x1x32xf32>
    %24 = vector.broadcast %23 : vector<1x1x32xf32> to vector<8x8x32xf32>
    %25 = arith.mulf %21, %24 : vector<8x8x32xf32>
    %c0_9 = arith.constant 0 : index
    %c0_10 = arith.constant 0 : index
    %26 = vector.load %arg5[%c0_9, %c0_10] : memref<1x32xf32, #tpu.memory_space<vmem>>, vector<1x32xf32>
    %27 = vector.shape_cast %26 : vector<1x32xf32> to vector<1x1x32xf32>
    %28 = vector.broadcast %27 : vector<1x1x32xf32> to vector<8x8x32xf32>
    %29 = arith.addf %25, %28 : vector<8x8x32xf32>
    %30 = vector.shape_cast %29 : vector<8x8x32xf32> to vector<64x32xf32>
    %31 = arith.truncf %30 : vector<64x32xf32> to vector<64x32xbf16>
    %c0_11 = arith.constant 0 : index
    %c0_12 = arith.constant 0 : index
    %32 = vector.load %arg6[%c0_11, %c0_12] : memref<32x512xbf16, #tpu.memory_space<vmem>>, vector<32x512xbf16>
    %cst_13 = arith.constant dense<0.000000e+00> : vector<64x512xf32>
    %33 = tpu.matmul %31, %32, %cst_13 {dimension_numbers = #tpu.dot_dimension_numbers<[1], [0], [0], [1], [0, 0, 1, 1], [], []>} : vector<64x32xbf16>, vector<32x512xbf16>, vector<64x512xf32> -> vector<64x512xf32>
    %c0_14 = arith.constant 0 : index
    %c0_15 = arith.constant 0 : index
    %34 = vector.load %arg7[%c0_14, %c0_15] : memref<1x512xf32, #tpu.memory_space<vmem>>, vector<1x512xf32>
    %35 = vector.broadcast %34 : vector<1x512xf32> to vector<64x512xf32>
    %36 = arith.addf %33, %35 : vector<64x512xf32>
    %37 = arith.truncf %36 : vector<64x512xf32> to vector<64x512xbf16>
    %38 = vector.shape_cast %37 : vector<64x512xbf16> to vector<8x8x512xbf16>
    %c0_16 = arith.constant 0 : index
    %c0_17 = arith.constant 0 : index
    %c0_18 = arith.constant 0 : index
    %39 = vector.load %arg14[%c0_16, %c0_17, %c0_18] : memref<8x8x512xbf16, #tpu.memory_space<vmem>>, vector<8x8x512xbf16>
    tpu.vector_store %arg14[%c0_16, %c0_17, %c0_18], %38 {strides = array<i32>} : memref<8x8x512xbf16, #tpu.memory_space<vmem>>, vector<8x8x512xbf16>,
    %c0_19 = arith.constant 0 : index
    %c0_20 = arith.constant 0 : index
    %40 = vector.load %arg3[%c0_19, %c0_20] : memref<8x1xi32, #tpu.memory_space<vmem>>, vector<8x1xi32>
    %41 = tpu.iota {dimensions = array<i32: 0>} : vector<8x8x1xi32>
    %42 = vector.shape_cast %40 : vector<8x1xi32> to vector<1x8x1xi32>
    %43 = vector.broadcast %42 : vector<1x8x1xi32> to vector<8x8x1xi32>
    %44 = arith.cmpi slt, %41, %43 : vector<8x8x1xi32>
    %45 = arith.extui %44 : vector<8x8x1xi1> to vector<8x8x1xi32>
    %46 = arith.sitofp %45 : vector<8x8x1xi32> to vector<8x8x1xf32>
    %c0_21 = arith.constant 0 : index
    %c0_22 = arith.constant 0 : index
    %c0_23 = arith.constant 0 : index
    %47 = vector.load %arg15[%c0_21, %c0_22, %c0_23] : memref<8x8x1xf32, #tpu.memory_space<vmem>>, vector<8x8x1xf32>
    tpu.vector_store %arg15[%c0_21, %c0_22, %c0_23], %46 {strides = array<i32>} : memref<8x8x1xf32, #tpu.memory_space<vmem>>, vector<8x8x1xf32>,
    %48 = tpu.iota {dimensions = array<i32: 1>} : vector<1x128xi32>
    %c32_i32 = arith.constant 32 : i32
    %49 = vector.broadcast %c32_i32 : i32 to vector<1x128xi32>
    %50 = arith.cmpi slt, %48, %49 : vector<1x128xi32>
    %51 = tpu.concatenate %50, %50, %50, %50 in 1 : vector<1x128xi1>, vector<1x128xi1>, vector<1x128xi1>, vector<1x128xi1> -> vector<1x512xi1>
    %c0_24 = arith.constant 0 : index
    %c0_25 = arith.constant 0 : index
    %52 = vector.load %arg8[%c0_24, %c0_25] : memref<128x512xbf16, #tpu.memory_space<vmem>>, vector<128x512xbf16>
    %53 = arith.index_cast %arg0 : i32 to index
    %54 = memref.load %arg1[%53] : memref<2xi32, #tpu.memory_space<smem>>
    %cst_26 = arith.constant 0.000000e+00 : f32
    %55 = vector.broadcast %cst_26 : f32 to vector<8x128xf32>
    %cst_27 = arith.constant 0.000000e+00 : f32
    %56 = vector.broadcast %cst_27 : f32 to vector<8x128xf32>
    %c0_i32 = arith.constant 0 : i32
    %57 = arith.subi %54, %c0_i32 : i32
    %58 = arith.addi %c0_i32, %57 : i32
    %c1_i32 = arith.constant 1 : i32
    %59:2 = scf.for %arg16 = %c0_i32 to %58 step %c1_i32 iter_args(%arg17 = %55, %arg18 = %56) -> (vector<8x128xf32>, vector<8x128xf32>)  : i32 {
      %c1_i32_44 = arith.constant 1 : i32
      %92 = arith.subi %54, %c1_i32_44 : i32
      %93 = arith.subi %92, %arg16 : i32
      %94 = arith.index_cast %arg16 : i32 to index
      %c0_45 = arith.constant 0 : index
      %c0_46 = arith.constant 0 : index
      %95 = vector.load %arg14[%94, %c0_45, %c0_46] : memref<8x8x512xbf16, #tpu.memory_space<vmem>>, vector<1x8x512xbf16>
      %96 = vector.shape_cast %95 : vector<1x8x512xbf16> to vector<8x512xbf16>
      %97 = arith.index_cast %93 : i32 to index
      %c0_47 = arith.constant 0 : index
      %c0_48 = arith.constant 0 : index
      %98 = vector.load %arg14[%97, %c0_47, %c0_48] : memref<8x8x512xbf16, #tpu.memory_space<vmem>>, vector<1x8x512xbf16>
      %99 = vector.shape_cast %98 : vector<1x8x512xbf16> to vector<8x512xbf16>
      %100 = vector.shape_cast %51 : vector<1x512xi1> to vector<1x512xi1>
      %101 = vector.broadcast %100 : vector<1x512xi1> to vector<8x512xi1>
      %102 = arith.select %101, %96, %99 : vector<8x512xi1>, vector<8x512xbf16>
      %103 = arith.extf %102 : vector<8x512xbf16> to vector<8x512xf32>
      %104 = arith.index_cast %arg16 : i32 to index
      %c0_49 = arith.constant 0 : index
      %c0_50 = arith.constant 0 : index
      %105 = vector.load %arg15[%104, %c0_49, %c0_50] : memref<8x8x1xf32, #tpu.memory_space<vmem>>, vector<1x8x1xf32>
      %106 = vector.shape_cast %105 : vector<1x8x1xf32> to vector<8x1xf32>
      %107 = arith.index_cast %93 : i32 to index
      %c0_51 = arith.constant 0 : index
      %c0_52 = arith.constant 0 : index
      %108 = vector.load %arg15[%107, %c0_51, %c0_52] : memref<8x8x1xf32, #tpu.memory_space<vmem>>, vector<1x8x1xf32>
      %109 = vector.shape_cast %108 : vector<1x8x1xf32> to vector<8x1xf32>
      %110 = vector.shape_cast %50 : vector<1x128xi1> to vector<1x128xi1>
      %111 = vector.broadcast %110 : vector<1x128xi1> to vector<8x128xi1>
      %112 = vector.shape_cast %106 : vector<8x1xf32> to vector<8x1xf32>
      %113 = vector.broadcast %112 : vector<8x1xf32> to vector<8x128xf32>
      %114 = vector.shape_cast %109 : vector<8x1xf32> to vector<8x1xf32>
      %115 = vector.broadcast %114 : vector<8x1xf32> to vector<8x128xf32>
      %116 = arith.select %111, %113, %115 : vector<8x128xi1>, vector<8x128xf32>
      %117 = arith.truncf %arg17 : vector<8x128xf32> to vector<8x128xbf16>
      %cst_53 = arith.constant dense<0.000000e+00> : vector<8x512xf32>
      %118 = tpu.matmul %117, %52, %cst_53 {dimension_numbers = #tpu.dot_dimension_numbers<[1], [0], [0], [1], [0, 0, 1, 1], [], []>} : vector<8x128xbf16>, vector<128x512xbf16>, vector<8x512xf32> -> vector<8x512xf32>
      %119 = arith.addf %118, %103 : vector<8x512xf32>
      %120 = vector.extract_strided_slice %119 {offsets = [0, 0], sizes = [8, 128], strides = [1, 1]} : vector<8x512xf32> to vector<8x128xf32>
      %121 = arith.negf %120 : vector<8x128xf32>
      %122 = math.exp %121 : vector<8x128xf32>
      %cst_54 = arith.constant 1.000000e+00 : f32
      %123 = vector.broadcast %cst_54 : f32 to vector<8x128xf32>
      %124 = arith.addf %123, %122 : vector<8x128xf32>
      %125 = arith.divf %123, %124 : vector<8x128xf32>
      %126 = vector.extract_strided_slice %119 {offsets = [0, 128], sizes = [8, 128], strides = [1, 1]} : vector<8x512xf32> to vector<8x128xf32>
      %127 = arith.negf %126 : vector<8x128xf32>
      %128 = math.exp %127 : vector<8x128xf32>
      %cst_55 = arith.constant 1.000000e+00 : f32
      %129 = vector.broadcast %cst_55 : f32 to vector<8x128xf32>
      %130 = arith.addf %129, %128 : vector<8x128xf32>
      %131 = arith.divf %129, %130 : vector<8x128xf32>
      %132 = vector.extract_strided_slice %119 {offsets = [0, 256], sizes = [8, 128], strides = [1, 1]} : vector<8x512xf32> to vector<8x128xf32>
      %133 = math.tanh %132 : vector<8x128xf32>
      %134 = vector.extract_strided_slice %119 {offsets = [0, 384], sizes = [8, 128], strides = [1, 1]} : vector<8x512xf32> to vector<8x128xf32>
      %135 = arith.negf %134 : vector<8x128xf32>
      %136 = math.exp %135 : vector<8x128xf32>
      %cst_56 = arith.constant 1.000000e+00 : f32
      %137 = vector.broadcast %cst_56 : f32 to vector<8x128xf32>
      %138 = arith.addf %137, %136 : vector<8x128xf32>
      %139 = arith.divf %137, %138 : vector<8x128xf32>
      %140 = arith.mulf %131, %arg18 : vector<8x128xf32>
      %141 = arith.mulf %125, %133 : vector<8x128xf32>
      %142 = arith.addf %140, %141 : vector<8x128xf32>
      %143 = math.tanh %142 : vector<8x128xf32>
      %144 = arith.mulf %139, %143 : vector<8x128xf32>
      %145 = arith.subf %144, %arg17 : vector<8x128xf32>
      %146 = arith.mulf %116, %145 : vector<8x128xf32>
      %147 = arith.addf %arg17, %146 : vector<8x128xf32>
      %148 = arith.subf %142, %arg18 : vector<8x128xf32>
      %149 = arith.mulf %116, %148 : vector<8x128xf32>
      %150 = arith.addf %arg18, %149 : vector<8x128xf32>
      scf.yield %147, %150 : vector<8x128xf32>, vector<8x128xf32>
    }
    %60 = vector.extract_strided_slice %59#0 {offsets = [0, 0], sizes = [8, 64], strides = [1, 1]} : vector<8x128xf32> to vector<8x64xf32>
    %cst_28 = arith.constant dense<0.000000e+00> : vector<8xf32>
    %61 = vector.multi_reduction <add>, %60, %cst_28 [1] : vector<8x64xf32> to vector<8xf32>
    %62 = vector.shape_cast %61 : vector<8xf32> to vector<8x1xf32>
    %cst_29 = arith.constant 6.400000e+01 : f32
    %63 = vector.broadcast %cst_29 : f32 to vector<8x1xf32>
    %64 = arith.divf %62, %63 : vector<8x1xf32>
    %65 = vector.broadcast %64 : vector<8x1xf32> to vector<8x64xf32>
    %66 = arith.subf %60, %65 : vector<8x64xf32>
    %67 = arith.mulf %66, %66 : vector<8x64xf32>
    %cst_30 = arith.constant dense<0.000000e+00> : vector<8xf32>
    %68 = vector.multi_reduction <add>, %67, %cst_30 [1] : vector<8x64xf32> to vector<8xf32>
    %69 = vector.shape_cast %68 : vector<8xf32> to vector<8x1xf32>
    %cst_31 = arith.constant 6.400000e+01 : f32
    %70 = vector.broadcast %cst_31 : f32 to vector<8x1xf32>
    %71 = arith.divf %69, %70 : vector<8x1xf32>
    %72 = vector.broadcast %64 : vector<8x1xf32> to vector<8x64xf32>
    %73 = arith.subf %60, %72 : vector<8x64xf32>
    %cst_32 = arith.constant 9.99999974E-6 : f32
    %74 = vector.broadcast %cst_32 : f32 to vector<8x1xf32>
    %75 = arith.addf %71, %74 : vector<8x1xf32>
    %76 = math.rsqrt %75 : vector<8x1xf32>
    %77 = vector.broadcast %76 : vector<8x1xf32> to vector<8x64xf32>
    %78 = arith.mulf %73, %77 : vector<8x64xf32>
    %c0_33 = arith.constant 0 : index
    %c0_34 = arith.constant 0 : index
    %79 = vector.load %arg9[%c0_33, %c0_34] : memref<1x64xf32, #tpu.memory_space<vmem>>, vector<1x64xf32>
    %80 = vector.broadcast %79 : vector<1x64xf32> to vector<8x64xf32>
    %81 = arith.mulf %78, %80 : vector<8x64xf32>
    %c0_35 = arith.constant 0 : index
    %c0_36 = arith.constant 0 : index
    %82 = vector.load %arg10[%c0_35, %c0_36] : memref<1x64xf32, #tpu.memory_space<vmem>>, vector<1x64xf32>
    %83 = vector.broadcast %82 : vector<1x64xf32> to vector<8x64xf32>
    %84 = arith.addf %81, %83 : vector<8x64xf32>
    %85 = arith.truncf %84 : vector<8x64xf32> to vector<8x64xbf16>
    %c0_37 = arith.constant 0 : index
    %c0_38 = arith.constant 0 : index
    %86 = vector.load %arg11[%c0_37, %c0_38] : memref<64x128xbf16, #tpu.memory_space<vmem>>, vector<64x128xbf16>
    %cst_39 = arith.constant dense<0.000000e+00> : vector<8x128xf32>
    %87 = tpu.matmul %85, %86, %cst_39 {dimension_numbers = #tpu.dot_dimension_numbers<[1], [0], [0], [1], [0, 0, 1, 1], [], []>} : vector<8x64xbf16>, vector<64x128xbf16>, vector<8x128xf32> -> vector<8x128xf32>
    %c0_40 = arith.constant 0 : index
    %c0_41 = arith.constant 0 : index
    %88 = vector.load %arg12[%c0_40, %c0_41] : memref<1x128xf32, #tpu.memory_space<vmem>>, vector<1x128xf32>
    %89 = vector.broadcast %88 : vector<1x128xf32> to vector<8x128xf32>
    %90 = arith.addf %87, %89 : vector<8x128xf32>
    %c0_42 = arith.constant 0 : index
    %c0_43 = arith.constant 0 : index
    %91 = vector.load %arg13[%c0_42, %c0_43] : memref<8x128xf32, #tpu.memory_space<vmem>>, vector<8x128xf32>
    tpu.vector_store %arg13[%c0_42, %c0_43], %90 {strides = array<i32>} : memref<8x128xf32, #tpu.memory_space<vmem>>, vector<8x128xf32>,
    return
  }
  func.func @transform_0(%arg0: i32, %arg1: memref<2xi32, #tpu.memory_space<smem>>) -> (i32, i32, i32) {
    %c0_i32 = arith.constant 0 : i32
    %c0_i32_0 = arith.constant 0 : i32
    %c0_i32_1 = arith.constant 0 : i32
    return %c0_i32, %arg0, %c0_i32_0 : i32, i32, i32
  }
  func.func @transform_1(%arg0: i32, %arg1: memref<2xi32, #tpu.memory_space<smem>>) -> (i32, i32) {
    %c0_i32 = arith.constant 0 : i32
    %c0_i32_0 = arith.constant 0 : i32
    return %arg0, %c0_i32 : i32, i32
  }
  func.func @transform_2(%arg0: i32, %arg1: memref<2xi32, #tpu.memory_space<smem>>) -> (i32, i32) {
    %c0_i32 = arith.constant 0 : i32
    %c0_i32_0 = arith.constant 0 : i32
    %c0_i32_1 = arith.constant 0 : i32
    return %c0_i32, %c0_i32_0 : i32, i32
  }
  func.func @transform_3(%arg0: i32, %arg1: memref<2xi32, #tpu.memory_space<smem>>) -> (i32, i32) {
    %c0_i32 = arith.constant 0 : i32
    %c0_i32_0 = arith.constant 0 : i32
    %c0_i32_1 = arith.constant 0 : i32
    return %c0_i32, %c0_i32_0 : i32, i32
  }
  func.func @transform_4(%arg0: i32, %arg1: memref<2xi32, #tpu.memory_space<smem>>) -> (i32, i32) {
    %c0_i32 = arith.constant 0 : i32
    %c0_i32_0 = arith.constant 0 : i32
    %c0_i32_1 = arith.constant 0 : i32
    return %c0_i32, %c0_i32_0 : i32, i32
  }
  func.func @transform_5(%arg0: i32, %arg1: memref<2xi32, #tpu.memory_space<smem>>) -> (i32, i32) {
    %c0_i32 = arith.constant 0 : i32
    %c0_i32_0 = arith.constant 0 : i32
    %c0_i32_1 = arith.constant 0 : i32
    return %c0_i32, %c0_i32_0 : i32, i32
  }
  func.func @transform_6(%arg0: i32, %arg1: memref<2xi32, #tpu.memory_space<smem>>) -> (i32, i32) {
    %c0_i32 = arith.constant 0 : i32
    %c0_i32_0 = arith.constant 0 : i32
    %c0_i32_1 = arith.constant 0 : i32
    return %c0_i32, %c0_i32_0 : i32, i32
  }
  func.func @transform_7(%arg0: i32, %arg1: memref<2xi32, #tpu.memory_space<smem>>) -> (i32, i32) {
    %c0_i32 = arith.constant 0 : i32
    %c0_i32_0 = arith.constant 0 : i32
    %c0_i32_1 = arith.constant 0 : i32
    return %c0_i32, %c0_i32_0 : i32, i32
  }
  func.func @transform_8(%arg0: i32, %arg1: memref<2xi32, #tpu.memory_space<smem>>) -> (i32, i32) {
    %c0_i32 = arith.constant 0 : i32
    %c0_i32_0 = arith.constant 0 : i32
    %c0_i32_1 = arith.constant 0 : i32
    return %c0_i32, %c0_i32_0 : i32, i32
  }
  func.func @transform_9(%arg0: i32, %arg1: memref<2xi32, #tpu.memory_space<smem>>) -> (i32, i32) {
    %c0_i32 = arith.constant 0 : i32
    %c0_i32_0 = arith.constant 0 : i32
    %c0_i32_1 = arith.constant 0 : i32
    return %c0_i32, %c0_i32_0 : i32, i32
  }
  func.func @transform_10(%arg0: i32, %arg1: memref<2xi32, #tpu.memory_space<smem>>) -> (i32, i32) {
    %c0_i32 = arith.constant 0 : i32
    %c0_i32_0 = arith.constant 0 : i32
    %c0_i32_1 = arith.constant 0 : i32
    return %c0_i32, %c0_i32_0 : i32, i32
  }
  func.func @transform_11(%arg0: i32, %arg1: memref<2xi32, #tpu.memory_space<smem>>) -> (i32, i32) {
    %c0_i32 = arith.constant 0 : i32
    %c0_i32_0 = arith.constant 0 : i32
    return %arg0, %c0_i32 : i32, i32
  }
}

</mosaic_0001>

<bundles_post_ra>
// kernel: tpu_custom_call.1
= control target key start
LH: loop header
LB: loop body
LE: loop exit
PB: predicated region body
PF: predicated region fallthrough
CT: control target
= control target key end

     0   :  { %s2995_s0 = inlined_call_operand.vmem [shape: s32[2], index: 0, kind: input, shape index: {}]   ;;  %s2996_s1 = inlined_call_operand.hbm [shape: bf16[8,16,32], index: 1, kind: input, shape index: {}]   ;;  %s2997_s2 = inlined_call_operand.vmem [shape: s32[16,1], index: 2, kind: input, shape index: {}]   ;;  %s2998_s3 = inlined_call_operand.vmem [shape: f32[1,32], index: 3, kind: input, shape index: {}]   ;;  %s2999_s4 = inlined_call_operand.vmem [shape: f32[1,32], index: 4, kind: input, shape index: {}]   ;;  %s3000_s5 = inlined_call_operand.hbm [shape: bf16[32,512], index: 5, kind: input, shape index: {}]   ;;  %s3001_s6 = inlined_call_operand.hbm [shape: f32[1,512], index: 6, kind: input, shape index: {}]   ;;  %s3002_s7 = inlined_call_operand.hbm [shape: bf16[128,512], index: 7, kind: input, shape index: {}]   ;;  %s3003_s8 = inlined_call_operand.hbm [shape: f32[1,64], index: 8, kind: input, shape index: {}]   ;;  %s3004_s9 = inlined_call_operand.hbm [shape: f32[1,64], index: 9, kind: input, shape index: {}]   ;;  %s3005_s10 = inlined_call_operand.vmem [shape: bf16[64,128], index: 10, kind: input, shape index: {}]   ;;  %s3006_s11 = inlined_call_operand.vmem [shape: f32[1,128], index: 11, kind: input, shape index: {}]   ;;  %s3007_s12 = inlined_call_operand.hbm [shape: f32[16,128], index: 12, kind: output, shape index: {}]  }
   0x1   :  { %3013 = sst [smem:[#allocation25_spill]] %s3000_s5  ;;  %s17_s23 = sshll.u32 %s2995_s0, 4  ;;  %s18_s23 = int_to_ptr.vmem [resolvable:$true] %s17_s23 }
   0x2   :  { %3014 = sst [smem:[#allocation26_spill]] %s3001_s6  ;;  %s2032_s24 = scalar_lea.vmem %s18_s23, 16 }
   0x3   :  { %3015 = sst [smem:[#allocation27_spill]] %s3002_s7  ;;  %p2033_p0 = scmp.ne.s32.totalorder %s18_s23, %s2032_s24 }
   0x4   :  { %3016 = sst [smem:[#allocation28_spill]] %s3003_s8  ;;  %p2037_p1 = scmp.lt.s32.totalorder %s18_s23, %s18_s23 }
   0x5   :  { %p2038_p2 = scmp.lt.s32.totalorder %s2032_s24, %s2032_s24 }
   0x7   :  { %p2039_p3 = por %p2038_p2, %p2037_p1 }
   0x9   :  { %p2040_p4 = pnand %p2039_p3, %p2033_p0 }
   0xb   :  { %2043 = shalt.err (!%p2040_p4)  }
   0xc   :  { %s2314_s25 = smov [#allocation5]  }
   0xd   :  { %20 = dma.vmem_to_smem %s18_s23, 16, %s2314_s25, [#allocation4] }
   0xe   :  { %2260 = dma.done.wait [#allocation4], 16 }
   0xf   :  { %2261 = vsyncadd [#allocation4], 4294967280 }
  0x10   :  { %22 = sfence }
  0x11   :  { %23 = vsyncpa [#allocation7], 0 }
  0x12   :  { %25 = vsyncpa [#allocation7 + $0x1], 0 }
  0x13   :  { %26 = vsyncpa [#allocation10], 0 }
  0x14   :  { %27 = vsyncpa [#allocation13], 0 }
  0x15   :  { %28 = vsyncpa [#allocation16], 0 }
  0x16   :  { %29 = vsyncpa [#allocation8], 0 }
  0x17   :  { %31 = vsyncpa [#allocation8 + $0x1], 0  ;;  %s2399_s0 = smov 0   ;;  %s2401_s26 = smov 0  }
  0x18   :  { %s2403_s27 = smov 0   ;;  %s2405_s28 = smov 0  }
  0x19 LB: > { %s2420_s29 = sadd.s32 4294967295, %s2296_s28   ;;  %s1672_s30 = sadd.s32 4294967294, %s2296_s28   ;;  %s2296_s28 = sphi %s2405_s28, %s3049_s28   ;;  %s2292_s27 = sphi %s2403_s27, %s3048_s27   ;;  %s2288_s26 = sphi %s2401_s26, %s3047_s26   ;;  %s2284_s0 = sphi %s2399_s0, %s3046_s0  }
  0x1a   : > { %p57_p5 = scmp.ne.s32.totalorder %s2288_s26, %s2284_s0  ;;  %p3008_p6 = scmp.eq.s32.totalorder %s2420_s29, 0 }
  0x1b   : > { %p302_p8 = scmp.eq.s32.totalorder %s1672_s30, 1  ;;  %p1673_p10 = scmp.ge.s32.totalorder %s2296_s28, 1 }
  0x1c   : > { %p2429_p9 = por %p3008_p6, %p57_p5  ;;  %p309_p12 = scmp.lt.s32.totalorder %s2296_s28, 3 }
  0x1d   : > { %p2434_p11 = por %p302_p8, %p57_p5  ;;  %s2315_s16 = smov [#allocation9]  }
  0x1e   : > { %s3017_s13 = scalar_select %p2429_p9, 1, 0 }
  0x1f   : > { %s3018_s14 = scalar_select %p2434_p11, 1, 0 }
  0x20   : > { %p2439_p13 = pnand %p1673_p10, %p309_p12  ;;  %s327_s17 = sshll.u32 %s2315_s16, 4  ;;  %s328_s17 = int_to_ptr.vmem [resolvable:$true] %s327_s17 }
  0x21   : > { %3019 = sst [smem:[#allocation24_spill]] %s3018_s14  ;;  %s2316_s19 = smov [#allocation12]  }
  0x22   : > { %s3020_s15 = scalar_select %p2439_p13, 1, 0 }
  0x23   : > { %p1866_p0 = pneg %p2439_p13  ;;  %s351_s20 = sshll.u32 %s2316_s19, 4  ;;  %s352_s20 = int_to_ptr.vmem [resolvable:$true] %s351_s20 }
  0x24   : > { %s2317_s21 = smov [#allocation11]   ;;  %s2055_s24 = scalar_lea.vmem %s328_s17, 1024 }
  0x25   : > { %p2448_p2 = pnand %p1866_p0, %p3008_p6  ;;  %s341_s22 = sshll.u32 %s2317_s21, 4  ;;  %s342_s22 = int_to_ptr.vmem [resolvable:$true] %s341_s22 }
  0x26   : > { %p2056_p4 = scmp.ne.s32.totalorder %s328_s17, %s2055_s24  ;;  %p2063_p10 = scmp.lt.s32.totalorder %s328_s17, %s328_s17 }
  0x27   : > { %p2454_p3 = pneg %p2448_p2  ;;  %p2064_p12 = scmp.lt.s32.totalorder %s2055_s24, %s2055_s24 }
  0x29   : > { %p2058_p5 = pnand %p2056_p4, %p2454_p3  ;;  %p2065_p0 = por %p2064_p12, %p2063_p10 }
  0x2b   : > { %p2059_p8 = pneg %p2058_p5 }
  0x2d   : > { %p2066_p1 = pnand %p2065_p0, %p2059_p8 }
  0x2f   : > { %2069 = shalt.err (!%p2066_p1)
}
  0x30   : > { %s2318_s25 = smov 256   ;;  %s2319_s30 = smov 16  }
  0x31   : > { %s3023_s5 = sld [smem:[#allocation25_spill]]  ;;  %s2081_s21 = scalar_lea.vmem %s352_s20, 4096 }
  0x32   : > { %p2082_p6 = scmp.ne.s32.totalorder %s352_s20, %s2081_s21  ;;  %p2089_p5 = scmp.lt.s32.totalorder %s352_s20, %s352_s20 }
  0x33   : > { %p2090_p11 = scmp.lt.s32.totalorder %s2081_s21, %s2081_s21 }
  0x34   : > { %p2084_p7 = pnand %p2082_p6, %p2454_p3 }
  0x35   : > { %p2091_p9 = por %p2090_p11, %p2089_p5 }
  0x36   : > { %p2085_p4 = pneg %p2084_p7 }
  0x37   : > { %1869 = dma.hbm_to_vmem [thread:$0]  (!%p2448_p2), %s3023_s5, 1024, %s328_s17, [#allocation10], %s2318_s25, %s2318_s25, %s2319_s30  }
  0x38   : > { %p2092_p10 = pnand %p2091_p9, %p2085_p4 }
  0x3a   : > { %2095 = shalt.err (!%p2092_p10)
}
  0x3b   : > { %s3024_s7 = sld [smem:[#allocation27_spill]]  ;;  %s2107_s16 = scalar_lea.vmem %s342_s22, 64 }
  0x3c   : > { %p2108_p1 = scmp.ne.s32.totalorder %s342_s22, %s2107_s16  ;;  %p2115_p6 = scmp.lt.s32.totalorder %s342_s22, %s342_s22 }
  0x3d   : > { %p2116_p7 = scmp.lt.s32.totalorder %s2107_s16, %s2107_s16 }
  0x3e   : > { %p2110_p8 = pnand %p2108_p1, %p2454_p3 }
  0x3f   : > { %p2117_p0 = por %p2116_p7, %p2115_p6 }
  0x40   : > { %p2111_p12 = pneg %p2110_p8 }
  0x41   : > { %1875 = dma.hbm_to_vmem [thread:$0]  (!%p2448_p2), %s3024_s7, 4096, %s352_s20, [#allocation13], %s2318_s25, %s2318_s25, %s2319_s30  }
  0x42   : > { %p2118_p13 = pnand %p2117_p0, %p2111_p12 }
  0x44   : > { %2121 = shalt.err (!%p2118_p13)
}
  0x45   : > { %s3025_s6 = sld [smem:[#allocation26_spill]]  ;;  %s2320_s14 = smov [#allocation14]  }
  0x46   : > { %s365_s20 = sshll.u32 %s2320_s14, 4  ;;  %s2321_s25 = smov [#allocation15]   ;;  %s366_s20 = int_to_ptr.vmem [resolvable:$true] %s365_s20 }
  0x47   : > { %s376_s30 = sshll.u32 %s2321_s25, 4  ;;  %s2133_s21 = scalar_lea.vmem %s366_s20, 16  ;;  %s377_s30 = int_to_ptr.vmem [resolvable:$true] %s376_s30 }
  0x48   : > { %p2134_p9 = scmp.ne.s32.totalorder %s366_s20, %s2133_s21  ;;  %s2140_s24 = scalar_lea.vmem %s366_s20, 32 }
  0x49   : > { %p2141_p5 = scmp.lt.s32.totalorder %s366_s20, %s366_s20  ;;  %p2142_p13 = scmp.lt.s32.totalorder %s2140_s24, %s2133_s21 }
  0x4a   : > { %p2136_p11 = pnand %p2134_p9, %p2454_p3 }
  0x4b   : > { %1872 = dma.hbm_to_vmem [thread:$0]  (!%p2448_p2), %s3025_s6, 64, %s342_s22, [#allocation10]  }
  0x4c   : > { %p2137_p4 = pneg %p2136_p11  ;;  %p2143_p10 = por %p2142_p13, %p2141_p5 }
  0x4e   : > { %p2144_p1 = pnand %p2143_p10, %p2137_p4 }
  0x50   : > { %2147 = shalt.err (!%p2144_p1)
}
  0x51   : > { %s3026_s8 = sld [smem:[#allocation28_spill]]  ;;  %s2159_s17 = scalar_lea.vmem %s377_s30, 16 }
  0x52   : > { %p2160_p8 = scmp.ne.s32.totalorder %s377_s30, %s2159_s17  ;;  %s2166_s19 = scalar_lea.vmem %s377_s30, 32 }
  0x53   : > { %p2167_p7 = scmp.lt.s32.totalorder %s377_s30, %s377_s30  ;;  %p2168_p0 = scmp.lt.s32.totalorder %s2166_s19, %s2159_s17 }
  0x54   : > { %p2162_p12 = pnand %p2160_p8, %p2454_p3 }
  0x55   : > { %p2169_p9 = por %p2168_p0, %p2167_p7 }
  0x56   : > { %p2163_p6 = pneg %p2162_p12 }
  0x57   : > { %1878 = dma.hbm_to_vmem [thread:$0]  (!%p2448_p2), %s3026_s8, 16, %s366_s20, [#allocation13]  }
  0x58   : > { %p2170_p11 = pnand %p2169_p9, %p2163_p6 }
  0x5a   : > { %2173 = shalt.err (!%p2170_p11)
}
  0x5b   : > { %1881 = dma.hbm_to_vmem [thread:$0]  (!%p2448_p2), %s3004_s9, 16, %s377_s30, [#allocation16]  }
  0x5c   : > { %s2494_s23 = sadd.s32 1, %s2296_s28   ;;  %s44_s18 = sadd.s32 1, %s2292_s27 }
  0x5d   : > { %s41_s20 = ssub.s32 %s2296_s28, %s2494_s23  ;;  %p51_p4 = scmp.ne.s32.totalorder %s2292_s27, %s2288_s26 }
  0x5e   : > { %p42_p3 = scmp.eq.s32.totalorder %s41_s20, 0  ;;  %p52_p5 = scmp.eq.s32.totalorder %s2296_s28, 0 }
  0x5f   : > { %p1895_p13 = scmp.lt.s32.totalorder %s2296_s28, 2  ;;  %p3027_p1 = scmp.eq.s32.totalorder %s2420_s29, 1 }
  0x60   : > { %s2504_s21 = scalar_select %p42_p3, %s2292_s27, %s44_s18  }
  0x61   : > { %p53_p10 = por %p52_p5, %p51_p4  ;;  %p2508_p8 = por %p3027_p1, %p51_p4 }
  0x62   : > { %s393_s16 = sand.u32 1, %s2292_s27   ;;  %s1681_s22 = sshll.u32 %s2296_s28, 6 }
  0x63   : > { %s3028_s24 = scalar_select %p2508_p8, 1, 0 }
  0x64   : > { %s1680_s30 = sshll.u32 %s393_s16, 5  ;;  %s2517_s14 = scalar_lea.hbm %s2996_s1, %s1681_s22 }
  0x65   : > { %s397_s25 = scalar_lea.vmem [#allocation6], %s1680_s30  ;;  %p2519_p2 = pnand %p1895_p13, %p53_p10 }
  0x66   : > { %s403_s20 = sshll.u32 %s397_s25, 4  ;;  %s2525_s5 = scalar_lea.sflag [#allocation7], %s393_s16  ;;  %s2523_s20 = int_to_ptr.vmem [resolvable:$true] %s403_s20 }
  0x67   : > { %s2174_s6 = scalar_lea.hbm %s2517_s14, 512  ;;  %p2176_p6 = pneg %p2519_p2 }
  0x68   : > { %p2175_p12 = scmp.ne.s32.totalorder %s2517_s14, %s2174_s6  ;;  %s2179_s30 = scalar_lea.hbm %s2996_s1, 1024 }
  0x69   : > { %p2180_p9 = scmp.lt.s32.totalorder %s2517_s14, %s2996_s1  ;;  %p2181_p11 = scmp.lt.s32.totalorder %s2179_s30, %s2174_s6 }
  0x6a   : > { %p2177_p7 = pnand %p2176_p6, %p2175_p12 }
  0x6b   : > { %p2182_p3 = por %p2181_p11, %p2180_p9 }
  0x6c   : > { %p2178_p0 = pneg %p2177_p7 }
  0x6e   : > { %p2183_p4 = pnand %p2182_p3, %p2178_p0 }
  0x70   : > { %2186 = shalt.err (!%p2183_p4)
}
  0x71   : > { %s2187_s16 = scalar_lea.vmem %s2523_s20, 512  ;;  %s2322_s7 = smov [#allocation6]  }
  0x72   : > { %p2188_p5 = scmp.ne.s32.totalorder %s2523_s20, %s2187_s16  ;;  %s2192_s8 = sshll.u32 %s2322_s7, 4  ;;  %s2193_s8 = int_to_ptr.vmem [resolvable:$false] %s2192_s8 }
  0x73   : > { %s2194_s22 = scalar_lea.vmem %s2193_s8, 1024  ;;  %p2195_p1 = scmp.lt.s32.totalorder %s2523_s20, %s2193_s8 }
  0x74   : > { %p2190_p13 = pnand %p2188_p5, %p2176_p6  ;;  %p2196_p12 = scmp.lt.s32.totalorder %s2194_s22, %s2187_s16 }
  0x76   : > { %p2191_p10 = pneg %p2190_p13  ;;  %p2197_p7 = por %p2196_p12, %p2195_p1 }
  0x78   : > { %p2198_p8 = pnand %p2197_p7, %p2191_p10 }
  0x7a   : > { %2201 = shalt.err (!%p2198_p8)
}
  0x7b   : > { %s2323_s6 = smov 128   ;;  %s2324_s17 = smov 64  }
  0x7c   : > { %s2325_s30 = smov 4   ;;  %p3030_p6 = scmp.ne.s32.totalorder %s3020_s15, 0 }
  0x7d   : > { %1885 = dma.hbm_to_vmem [thread:$0]  (!%p2519_p2), %s2517_s14, 512, %s2523_s20, %s2525_s5, %s2323_s6, %s2324_s17, %s2325_s30  }
  0x7e   : > { %422 = sbr.rel (%p3030_p6) target bundleno = 1515 (0x5eb), region = 64  ;;  %s2549_s7 = sand.u32 (!%p3030_p6), 1, %s2288_s26  }
  0x7f   : > { %s1683_s8 = sshll.u32 (!%p3030_p6), %s2549_s7, 5  ;;  %s425_s19 = scalar_lea.sflag (!%p3030_p6), [#allocation7], %s2549_s7 }
  0x80   : > { %s2553_s25 = scalar_lea.vmem (!%p3030_p6), [#allocation6], %s1683_s8  ;;  %p3031_p8 = scmp.ne.s32.totalorder (!%p3030_p6), %s3017_s13, 0 }
  0x83   : > { %2263 = dma.done.wait (%p3031_p8), %s425_s19, 512  }
  0x84   : > { %2265 = vsyncadd (%p3031_p8), %s425_s19, 4294966784  ;;  %p3032_p2 = scmp.eq.s32.totalorder %s2420_s29, 0 }
  0x86   : > { %2267 = dma.done.wait (%p3032_p2), [#allocation10], 1088   ;;  %p3033_p0 = pmov %p3032_p2 }
  0x88   : > { %2269 = vsyncadd (%p3033_p0), [#allocation10], 4294966208  ;;  %p3034_p9 = pmov %p3033_p0 }
  0x89   : > { %p3035_p11 = pmov %p3033_p0 }
  0x8a   : > { %2271 = dma.done.wait (%p3034_p9), [#allocation13], 4112  }
  0x8b   : > { %2273 = vsyncadd (%p3035_p11), [#allocation13], 4294963184  ;;  %p3036_p3 = pmov %p3033_p0 }
  0x8c   : > { %p3037_p4 = pmov %p3033_p0 }
  0x8d   : > { %2275 = dma.done.wait (%p3036_p3), [#allocation16], 16  }
  0x8e   : > { %2277 = vsyncadd (%p3037_p4), [#allocation16], 4294967280  ;;  %p491_p5 = scmp.lt.s32.totalorder %s2420_s29, 1  ;;  %s2573_s5 = sld [smem:[#allocation5 + %s2420_s29]]  ;;  %vm1025_vm0 = vcmask 7168   ;;  %v2579_v1 = vld [vmem:[#allocation12] sm:$0xff] }
  0x8f   : > { %v2581_v2 = vld [vmem:[#allocation12 + $0x8] sm:$0xff]  ;;  %v2583_v3 = vld [vmem:[#allocation12 + $0x10] sm:$0xff]  ;;  %v2585_v4 = vld [vmem:[#allocation12 + $0x18] sm:$0xff]  ;;  %v2326_v7 = vmov 0.0   ;;  %vm520_vm9 = vcmask 261120   ;;  %s1689_s16 = sshll.u32 %s2549_s7, 3 }
  0x90   : > { %s492_s13 = scalar_select %p491_p5, %s2420_s29, 1  ;;  %v2587_v5 = vld [vmem:[#allocation12 + $0x20] sm:$0xff]  ;;  %v2589_v6 = vld [vmem:[#allocation12 + $0x28] sm:$0xff]  ;;  %v2595_v12 = vld [vmem:[#allocation12 + $0x30] sm:$0xff] }
  0x91   : > { %v2597_v13 = vld [vmem:[#allocation12 + $0x38] sm:$0xff]  ;;  %v2607_v18 = vld [vmem:[#allocation12 + $0x40] sm:$0xff]  ;;  %v2609_v19 = vld [vmem:[#allocation12 + $0x48] sm:$0xff]  ;;  %s2795_s8 = scalar_lea.vmem [#allocation17], %s1689_s16 }
  0x92   : > { %s1690_s15 = sshll.u32 %s492_s13, 3  ;;  %v2615_v20 = vld [vmem:[#allocation12 + $0x50] sm:$0xff]  ;;  %v2617_v21 = vld [vmem:[#allocation12 + $0x58] sm:$0xff]  ;;  %v2619_v22 = vld [vmem:[#allocation12 + $0x60] sm:$0xff] }
  0x93   : > { %s494_s18 = scalar_lea.vmem %s2997_s2, %s1690_s15  ;;  %v2621_v23 = vld [vmem:[#allocation12 + $0x68] sm:$0xff]  ;;  %v2623_v24 = vld [vmem:[#allocation12 + $0x70] sm:$0xff]  ;;  %v2625_v25 = vld [vmem:[#allocation12 + $0x78] sm:$0xff] }
  0x94   : > { %v1000_v0 = vld [vmem:[%s494_s18] sm:$0xff]  ;;  %v2629_v27 = vld [vmem:[#allocation12 + $0x88] sm:$0xff]  ;;  %v2631_v28 = vld [vmem:[#allocation12 + $0x90] sm:$0xff]  ;;  %p1733_p13 = scmp.le.s32.totalorder %s2573_s5, 0 }
  0x95   : > { %vm1001_vm1 = vcmp.gt.s32.totalorder %v1000_v0, 0  ;;  %vm1002_vm2 = vcmp.gt.s32.totalorder %v1000_v0, 1  ;;  %vm1003_vm3 = vcmp.gt.s32.totalorder %v1000_v0, 2  ;;  %vm1004_vm4 = vcmp.gt.s32.totalorder %v1000_v0, 3  ;;  %v2627_v26 = vld [vmem:[#allocation12 + $0x80] sm:$0xff]  ;;  %v2633_v29 = vld [vmem:[#allocation12 + $0x98] sm:$0xff] }
  0x96   : > { %vm1005_vm5 = vcmp.gt.s32.totalorder %v1000_v0, 4  ;;  %vm1006_vm6 = vcmp.gt.s32.totalorder %v1000_v0, 5  ;;  %vm1007_vm7 = vcmp.gt.s32.totalorder %v1000_v0, 6  ;;  %vm1008_vm8 = vcmp.gt.s32.totalorder %v1000_v0, 7  ;;  %v2635_v30 = vld [vmem:[#allocation12 + $0xa0] sm:$0xff]  ;;  %v2637_v31 = vld [vmem:[#allocation12 + $0xa8] sm:$0xff] }
  0x97   : > { %v1725_v8 = vsel %vm1001_vm1, 1.0, %v2326_v7  ;;  %v1726_v9 = vsel %vm1002_vm2, 1.0, %v2326_v7  ;;  %v1727_v10 = vsel %vm1003_vm3, 1.0, %v2326_v7  ;;  %v1728_v11 = vsel %vm1004_vm4, 1.0, %v2326_v7  ;;  %v2639_v32 = vld [vmem:[#allocation12 + $0xb0] sm:$0xff]  ;;  %v2641_v33 = vld [vmem:[#allocation12 + $0xb8] sm:$0xff] }
  0x98   : > { %v1729_v14 = vsel %vm1005_vm5, 1.0, %v2326_v7  ;;  %v1730_v15 = vsel %vm1006_vm6, 1.0, %v2326_v7  ;;  %v1731_v16 = vsel %vm1007_vm7, 1.0, %v2326_v7  ;;  %v1732_v17 = vsel %vm1008_vm8, 1.0, %v2326_v7  ;;  %1026 = vst.msk [vmem:[#allocation3] sm:$0xff] %vm1025_vm0, %v1725_v8  ;;  %1027 = vst.msk [vmem:[#allocation3 + $0x8] sm:$0xff] %vm1025_vm0, %v1726_v9 }
  0x99   : > { %1028 = vst.msk [vmem:[#allocation3 + $0x10] sm:$0xff] %vm1025_vm0, %v1727_v10  ;;  %1029 = vst.msk [vmem:[#allocation3 + $0x18] sm:$0xff] %vm1025_vm0, %v1728_v11  ;;  %v2643_v34 = vld [vmem:[#allocation12 + $0xc0] sm:$0xff]  ;;  %v2645_v35 = vld [vmem:[#allocation12 + $0xc8] sm:$0xff]  ;;  %s2804_s19 = smov (!%p1733_p13), 0  }
  0x9a   : > { %1030 = vst.msk [vmem:[#allocation3 + $0x20] sm:$0xff] %vm1025_vm0, %v1729_v14  ;;  %1031 = vst.msk [vmem:[#allocation3 + $0x28] sm:$0xff] %vm1025_vm0, %v1730_v15  ;;  %v2647_v36 = vld [vmem:[#allocation12 + $0xd0] sm:$0xff]  ;;  %v2649_v37 = vld [vmem:[#allocation12 + $0xd8] sm:$0xff] }
  0x9b   : > { %1032 = vst.msk [vmem:[#allocation3 + $0x30] sm:$0xff] %vm1025_vm0, %v1731_v16  ;;  %1033 = vst.msk [vmem:[#allocation3 + $0x38] sm:$0xff] %vm1025_vm0, %v1732_v17  ;;  %v2651_v38 = vld [vmem:[#allocation12 + $0xe0] sm:$0xff]  ;;  %v2653_v39 = vld [vmem:[#allocation12 + $0xe8] sm:$0xff] }
  0x9c   : > { %v2655_v40 = vld [vmem:[#allocation12 + $0xf0] sm:$0xff]  ;;  %v2657_v41 = vld [vmem:[#allocation12 + $0xf8] sm:$0xff]  ;;  %v1822_v43 = vld [vmem:[%s2553_s25 + $0x8] sm:$0xff]  }
  0x9d   : > { %v1807_v42 = vld [vmem:[%s2553_s25] sm:$0xff]   ;;  %v1812_v45 = vunpack.c.l.bf16 %v1822_v43  ;;  %v1813_v47 = vunpack.c.h.bf16 %v1822_v43  ;;  %v1823_v48 = vld [vmem:[%s2553_s25 + $0x10] sm:$0xff]   ;;  %v1824_v49 = vld [vmem:[%s2553_s25 + $0x18] sm:$0xff]  }
  0x9e   : > { %v1808_v44 = vunpack.c.l.bf16 %v1807_v42  ;;  %v1809_v46 = vunpack.c.h.bf16 %v1807_v42  ;;  %v1816_v50 = vunpack.c.l.bf16 %v1823_v48  ;;  %v1817_v51 = vunpack.c.h.bf16 %v1823_v48 }
  0x9f   : > { %v514_v53 = vmax.f32 %v1812_v45, 0.0  ;;  %v515_v55 = vmax.f32 %v1813_v47, 0.0  ;;  %v1820_v58 = vunpack.c.l.bf16 %v1824_v49  ;;  %v1821_v59 = vunpack.c.h.bf16 %v1824_v49 }
  0xa0   : > { %v512_v52 = vmax.f32 %v1808_v44, 0.0  ;;  %v513_v54 = vmax.f32 %v1809_v46, 0.0  ;;  %v516_v62 = vmax.f32 %v1816_v50, 0.0  ;;  %v517_v63 = vmax.f32 %v1817_v51, 0.0 }
  0xa1   : > { %v527_v57 = vsel %vm520_vm9, %v514_v53, 0.0  ;;  %v530_v61 = vsel %vm520_vm9, %v515_v55, 0.0  ;;  %v518_v9 = vmax.f32 %v1820_v58, 0.0  ;;  %v519_v10 = vmax.f32 %v1821_v59, 0.0 }
  0xa2   : > { %v521_v56 = vsel %vm520_vm9, %v512_v52, 0.0  ;;  %528 = vadd.xlane.f32.xlu1 %v527_v57  ;;  %v524_v60 = vsel %vm520_vm9, %v513_v54, 0.0  ;;  %v533_v0 = vsel %vm520_vm9, %v516_v62, 0.0  ;;  %v536_v8 = vsel %vm520_vm9, %v517_v63, 0.0 }
  0xa3   : > { %522 = vadd.xlane.f32.xlu0 %v521_v56  ;;  %v539_v11 = vsel %vm520_vm9, %v518_v9, 0.0  ;;  %v542_v14 = vsel %vm520_vm9, %v519_v10, 0.0 }
  0xa6   : > { %531 = vadd.xlane.f32.xlu1 %v530_v61 }
  0xa7   : > { %525 = vadd.xlane.f32.xlu0 %v524_v60 }
  0xaa   : > { %537 = vadd.xlane.f32.xlu1 %v536_v8 }
  0xab   : > { %534 = vadd.xlane.f32.xlu0 %v533_v0 }
  0xae   : > { %543 = vadd.xlane.f32.xlu1 %v542_v14 }
  0xaf   : > { %540 = vadd.xlane.f32.xlu0 %v539_v11 }
 0x12b   : > { %v529_v16 = vpop.xlane.xlu1 %528 }
 0x12c   : > { %v523_v15 = vpop.xlane.xlu0 %522  ;;  %v548_v42 = vmul.f32 0.03125, %v529_v16 }
 0x12d   : > { %v546_v17 = vmul.f32 0.03125, %v523_v15 }
 0x12e   : > { %v2673_v44 = vsub.f32 %v514_v53, %v548_v42 }
 0x12f   : > { %v2671_v43 = vsub.f32 %v512_v52, %v546_v17  ;;  %v532_v46 = vpop.xlane.xlu1 %531 }
 0x130   : > { %v526_v45 = vpop.xlane.xlu0 %525  ;;  %v549_v48 = vmul.f32 0.03125, %v532_v46  ;;  %v564_v50 = vmul.f32 %v2673_v44, %v2673_v44 }
 0x131   : > { %v547_v47 = vmul.f32 0.03125, %v526_v45  ;;  %v562_v49 = vmul.f32 %v2671_v43, %v2671_v43 }
 0x132   : > { %v2681_v56 = vsub.f32 %v515_v55, %v549_v48  ;;  %v576_v58 = vsel %vm520_vm9, %v564_v50, 0.0 }
 0x133   : > { %v2679_v51 = vsub.f32 %v513_v54, %v547_v47  ;;  %v570_v57 = vsel %vm520_vm9, %v562_v49, 0.0  ;;  %v538_v53 = vpop.xlane.xlu1 %537 }
 0x134   : > { %571 = vadd.xlane.f32.xlu0 %v570_v57  ;;  %v535_v52 = vpop.xlane.xlu0 %534  ;;  %v551_v60 = vmul.f32 0.03125, %v538_v53  ;;  %v565_v0 = vmul.f32 %v2681_v56, %v2681_v56  ;;  %v1983_v57 = vld [vmem:[#allocation9 + $0x2c] ss:$16 sps:$4 sm:$0xff]   ;;  %v1986_v53 = vld [vmem:[#allocation9 + $0x28] ss:$16 sps:$4 sm:$0xff]  }
 0x135   : > { %v550_v59 = vmul.f32 0.03125, %v535_v52  ;;  %v563_v61 = vmul.f32 %v2679_v51, %v2679_v51  ;;  %v1985_v52 = vld [vmem:[#allocation9 + $0x20] ss:$16 sps:$4 sm:$0xff]   ;;  %827 = vmatprep.subr.bf16.mxu1 %v1983_v57 }
 0x136   : > { %v2691_v54 = vsub.f32 %v517_v63, %v551_v60  ;;  %v579_v15 = vsel %vm520_vm9, %v565_v0, 0.0  ;;  %v1989_v60 = vld [vmem:[#allocation9 + $0xc] ss:$16 sps:$4 sm:$0xff]   ;;  %828 = vmatpush1.bf16.msra.mxu1 %v1986_v53  ;;  %v1992_v0 = vld [vmem:[#allocation9 + $0x8] ss:$16 sps:$4 sm:$0xff]  }
 0x137   : > { %v2689_v8 = vsub.f32 %v516_v62, %v550_v59  ;;  %v573_v55 = vsel %vm520_vm9, %v563_v61, 0.0  ;;  %v544_v14 = vpop.xlane.xlu1 %543  ;;  %v1987_v59 = vld [vmem:[#allocation9 + $0x4] ss:$16 sps:$4 sm:$0xff]   ;;  %v1991_v61 = vld [vmem:[#allocation9] ss:$16 sps:$4 sm:$0xff]   ;;  %829 = vmatprep.subr.bf16.mxu1 %v1989_v60 }
 0x138   : > { %577 = vadd.xlane.f32.xlu0 %v576_v58  ;;  %574 = vadd.xlane.f32.xlu1 %v573_v55  ;;  %v541_v11 = vpop.xlane.xlu0 %540  ;;  %v553_v17 = vmul.f32 0.03125, %v544_v14  ;;  %v567_v62 = vmul.f32 %v2691_v54, %v2691_v54  ;;  %v2327_v58 = vmov 0  }
 0x139   : > { %v552_v16 = vmul.f32 0.03125, %v541_v11  ;;  %v566_v42 = vmul.f32 %v2689_v8, %v2689_v8  ;;  %774 = vmatprep.mubr.bf16.mxu0 %v2327_v58  ;;  %847 = vmatprep.mubr.bf16.mxu1 %v2327_v58 }
 0x13a   : > { %v2701_v63 = vsub.f32 %v519_v10, %v553_v17  ;;  %v585_v47 = vsel %vm520_vm9, %v567_v62, 0.0  ;;  %v1981_v10 = vld [vmem:[#allocation9 + $0x24] ss:$16 sps:$4 sm:$0xff]   ;;  %830 = vmatpush1.bf16.msra.mxu1 %v1992_v0 }
 0x13b   : > { %v2699_v45 = vsub.f32 %v518_v9, %v552_v16  ;;  %v582_v46 = vsel %vm520_vm9, %v566_v42, 0.0  ;;  %754 = vmatprep.subr.bf16.mxu0 %v1981_v10 }
 0x13c   : > { %580 = vadd.xlane.f32.xlu1 %v579_v15  ;;  %583 = vadd.xlane.f32.xlu0 %v582_v46  ;;  %v569_v49 = vmul.f32 %v2701_v63, %v2701_v63 }
 0x13d   : > { %v568_v48 = vmul.f32 %v2699_v45, %v2699_v45  ;;  %755 = vmatpush1.bf16.msra.mxu0 %v1985_v52 }
 0x13e   : > { %v591_v9 = vsel %vm520_vm9, %v569_v49, 0.0  ;;  %756 = vmatprep.subr.bf16.mxu0 %v1987_v59 }
 0x13f   : > { %v588_v50 = vsel %vm520_vm9, %v568_v48, 0.0 }
 0x140   : > { %586 = vadd.xlane.f32.xlu1 %v585_v47  ;;  %589 = vadd.xlane.f32.xlu0 %v588_v50 }
 0x141   : > { %757 = vmatpush1.bf16.msra.mxu0 %v1991_v61 }
 0x144   : > { %592 = vadd.xlane.f32.xlu1 %v591_v9 }
 0x1bd   : > { %v572_v55 = vpop.xlane.xlu0 %571 }
 0x1be   : > { %v594_v11 = vmul.f32 0.03125, %v572_v55 }
 0x1c0   : > { %v602_v14 = vadd.f32 1e-05, %v594_v11 }
 0x1c1   : > { %v575_v15 = vpop.xlane.xlu1 %574  ;;  %v578_v16 = vpop.xlane.xlu0 %577 }
 0x1c2   : > { %1993 = vrsqrt.f32 %v602_v14  ;;  %v595_v17 = vmul.f32 0.03125, %v575_v15  ;;  %v596_v42 = vmul.f32 0.03125, %v578_v16  ;;  %v1691_v14 = vld [vmem:[%s2998_s3] ss:$0 sm:$0xff] }
 0x1c4   : > { %v603_v62 = vadd.f32 1e-05, %v595_v17  ;;  %v604_v46 = vadd.f32 1e-05, %v596_v42 }
 0x1c5   : > { %v581_v47 = vpop.xlane.xlu1 %580  ;;  %v584_v48 = vpop.xlane.xlu0 %583 }
 0x1c6   : > { %1995 = vrsqrt.f32 %v603_v62  ;;  %v597_v49 = vmul.f32 0.03125, %v581_v47  ;;  %v598_v9 = vmul.f32 0.03125, %v584_v48  ;;  %v1692_v47 = vld [vmem:[%s2999_s4] ss:$0 sm:$0xff] }
 0x1c7   : > { %1997 = vrsqrt.f32 %v604_v46 }
 0x1c8   : > { %v605_v50 = vadd.f32 1e-05, %v597_v49  ;;  %v606_v52 = vadd.f32 1e-05, %v598_v9 }
 0x1c9   : > { %v587_v10 = vpop.xlane.xlu1 %586  ;;  %v590_v59 = vpop.xlane.xlu0 %589 }
 0x1ca   : > { %1999 = vrsqrt.f32 %v605_v50  ;;  %v599_v57 = vmul.f32 0.03125, %v587_v10  ;;  %v600_v55 = vmul.f32 0.03125, %v590_v59 }
 0x1cc   : > { %v607_v53 = vadd.f32 1e-05, %v599_v57  ;;  %v608_v17 = vadd.f32 1e-05, %v600_v55 }
 0x1cd   : > { %v593_v60 = vpop.xlane.xlu1 %592 }
 0x1ce   : > { %2001 = vrsqrt.f32 %v607_v53  ;;  %v601_v61 = vmul.f32 0.03125, %v593_v60 }
 0x1cf   : > { %v1994_v0 = vpop.eup %1993  ;;  %2003 = vrsqrt.f32 %v606_v52 }
 0x1d0   : > { %v618_v11 = vmul.f32 %v1994_v0, %v2671_v43  ;;  %v609_v15 = vadd.f32 1e-05, %v601_v61 }
 0x1d2   : > { %v633_v62 = vmul.f32 %v1691_v14, %v618_v11  ;;  %2005 = vrsqrt.f32 %v609_v15 }
 0x1d3   : > { %v1996_v16 = vpop.eup %1995  ;;  %2007 = vrsqrt.f32 %v608_v17 }
 0x1d4   : > { %v619_v42 = vmul.f32 %v1996_v16, %v2679_v51  ;;  %v1998_v46 = vpop.eup %1997  ;;  %v648_v43 = vadd.f32 %v1692_v47, %v633_v62 }
 0x1d5   : > { %v620_v9 = vmul.f32 %v1998_v46, %v2673_v44 }
 0x1d6   : > { %v634_v48 = vmul.f32 %v1691_v14, %v619_v42 }
 0x1d7   : > { %v2000_v49 = vpop.eup %1999  ;;  %v635_v51 = vmul.f32 %v1691_v14, %v620_v9 }
 0x1d8   : > { %v649_v50 = vadd.f32 %v1692_v47, %v634_v48  ;;  %v621_v10 = vmul.f32 %v2000_v49, %v2681_v56 }
 0x1d9   : > { %v650_v0 = vadd.f32 %v1692_v47, %v635_v51 }
 0x1da   : > { %v656_v57 = vpack.c.bf16 %v649_v50, %v648_v43  ;;  %v636_v52 = vmul.f32 %v1691_v14, %v621_v10 }
 0x1db   : > { %v2002_v53 = vpop.eup %2001 }
 0x1dc   : > { %1701 = vmatmul.mubr.msk.bf16.vlgmr.msra.gmra.mxu0 %vm520_vm9, %v656_v57  ;;  %1705 = vmatmul.mubr.msk.bf16.vlgmr.msra.gmra.mxu1 %vm520_vm9, %v656_v57  ;;  %v2004_v59 = vpop.eup %2003  ;;  %v651_v60 = vadd.f32 %v1692_v47, %v636_v52  ;;  %v623_v61 = vmul.f32 %v2002_v53, %v2691_v54  ;;  %v668_v57 = vld [vmem:[#allocation11] sm:$0xf] }
 0x1dd   : > { %784 = vmatprep.mubr.bf16.mxu0 %v2327_v58  ;;  %857 = vmatprep.mubr.bf16.mxu1 %v2327_v58  ;;  %v622_v44 = vmul.f32 %v2004_v59, %v2689_v8 }
 0x1de   : > { %v657_v56 = vpack.c.bf16 %v651_v60, %v650_v0  ;;  %v638_v55 = vmul.f32 %v1691_v14, %v623_v61 }
 0x1df   : > { %v2006_v11 = vpop.eup %2005  ;;  %v637_v16 = vmul.f32 %v1691_v14, %v622_v44 }
 0x1e0   : > { %v2008_v15 = vpop.eup %2007  ;;  %v653_v17 = vadd.f32 %v1692_v47, %v638_v55  ;;  %v625_v42 = vmul.f32 %v2006_v11, %v2701_v63  ;;  %v670_v63 = vlaneseq }
 0x1e1   : > { %v652_v54 = vadd.f32 %v1692_v47, %v637_v16  ;;  %v624_v62 = vmul.f32 %v2008_v15, %v2699_v45 }
 0x1e2   : > { %v640_v46 = vmul.f32 %v1691_v14, %v625_v42  ;;  %v2742_v45 = vand.u32 127, %v670_v63  ;;  %v2745_v9 = vshrl.u32 %v670_v63, 7 }
 0x1e3   : > { %v658_v8 = vpack.c.bf16 %v653_v17, %v652_v54  ;;  %v639_v48 = vmul.f32 %v1691_v14, %v624_v62 }
 0x1e4   : > { %1702 = vmatmul.mubr.msk.bf16.gmra.mxu0 %vm520_vm9, %v657_v56  ;;  %1706 = vmatmul.mubr.msk.bf16.gmra.mxu1 %vm520_vm9, %v657_v56  ;;  %v655_v49 = vadd.f32 %v1692_v47, %v640_v46  ;;  %vm1036_vm10 = vcmp.lt.s32.totalorder %v2742_v45, 32  ;;  %v672_v14 = vsub.s32 0, %v2745_v9  ;;  %v680_v10 = vsub.s32 2, %v2745_v9 }
 0x1e5   : > { %794 = vmatprep.mubr.bf16.mxu0 %v2327_v58  ;;  %867 = vmatprep.mubr.bf16.mxu1 %v2327_v58  ;;  %v654_v43 = vadd.f32 %v1692_v47, %v639_v48  ;;  %v684_v47 = vsub.s32 3, %v2745_v9 }
 0x1e6   : > { %v2753_v52 = vrot.slane %v668_v57, %v672_v14  ;;  %v2755_v53 = vrot.slane %v668_v57, %v680_v10 }
 0x1e7   : > { %v659_v50 = vpack.c.bf16 %v655_v49, %v654_v43  ;;  %v2759_v59 = vrot.slane %v668_v57, %v684_v47 }
 0x1ec   : > { %1703 = vmatmul.mubr.msk.bf16.gmra.mxu0 %vm520_vm9, %v658_v8  ;;  %1707 = vmatmul.mubr.msk.bf16.gmra.mxu1 %vm520_vm9, %v658_v8 }
 0x1ed   : > { %804 = vmatprep.mubr.bf16.mxu0 %v2327_v58  ;;  %877 = vmatprep.mubr.bf16.mxu1 %v2327_v58  ;;  %v676_v58 = vsub.s32 1, %v2745_v9 }
 0x1ef   : > { %v2757_v51 = vrot.slane %v668_v57, %v676_v58 }
 0x1f4   : > { %1704 = vmatmul.mubr.msk.bf16.gmra.mxu0 %vm520_vm9, %v659_v50  ;;  %1708 = vmatmul.mubr.msk.bf16.gmra.mxu1 %vm520_vm9, %v659_v50 }
 0x29c   : > { %v776_v60 = vpop.f32.mrf.mxu0  ;;  %v849_v61 = vpop.f32.mrf.mxu1 }
 0x29d   : > { %v777_v56 = vadd.f32 %v776_v60, %v2753_v52  ;;  %v850_v55 = vadd.f32 %v849_v61, %v2755_v53 }
 0x29e   : > { %v778_v0 = vpop.f32.mrf.mxu0  ;;  %v851_v44 = vpop.f32.mrf.mxu1 }
 0x29f   : > { %v779_v11 = vadd.f32 %v778_v0, %v2757_v51  ;;  %v852_v15 = vadd.f32 %v851_v44, %v2759_v59 }
 0x2a0   : > { %v780_v16 = vpop.f32.mrf.mxu0  ;;  %v853_v17 = vpop.f32.mrf.mxu1 }
 0x2a1   : > { %v1788_v42 = vpack.c.bf16 %v779_v11, %v777_v56  ;;  %v1789_v54 = vpack.c.bf16 %v852_v15, %v850_v55  ;;  %v781_v46 = vadd.f32 %v780_v16, %v2753_v52  ;;  %v854_v48 = vadd.f32 %v853_v17, %v2755_v53 }
 0x2a2   : > { %v782_v62 = vpop.f32.mrf.mxu0  ;;  %v855_v8 = vpop.f32.mrf.mxu1 }
 0x2a3   : > { %984 = vst [vmem:[#allocation2] sm:$0xff] %v1788_v42  ;;  %985 = vst [vmem:[#allocation2 + $0x8] sm:$0xff] %v1789_v54  ;;  %v783_v49 = vadd.f32 %v782_v62, %v2757_v51  ;;  %v856_v43 = vadd.f32 %v855_v8, %v2759_v59 }
 0x2a4   : > { %v786_v50 = vpop.f32.mrf.mxu0  ;;  %v859_v63 = vpop.f32.mrf.mxu1 }
 0x2a5   : > { %v1790_v10 = vpack.c.bf16 %v783_v49, %v781_v46  ;;  %v1791_v58 = vpack.c.bf16 %v856_v43, %v854_v48  ;;  %v787_v60 = vadd.f32 %v786_v50, %v2753_v52  ;;  %v860_v61 = vadd.f32 %v859_v63, %v2755_v53 }
 0x2a6   : > { %v788_v47 = vpop.f32.mrf.mxu0  ;;  %v861_v57 = vpop.f32.mrf.mxu1 }
 0x2a7   : > { %986 = vst [vmem:[#allocation2 + $0x10] sm:$0xff] %v1790_v10  ;;  %987 = vst [vmem:[#allocation2 + $0x18] sm:$0xff] %v1791_v58  ;;  %v789_v0 = vadd.f32 %v788_v47, %v2757_v51  ;;  %v862_v44 = vadd.f32 %v861_v57, %v2759_v59 }
 0x2a8   : > { %v790_v56 = vpop.f32.mrf.mxu0  ;;  %v863_v55 = vpop.f32.mrf.mxu1 }
 0x2a9   : > { %v1792_v11 = vpack.c.bf16 %v789_v0, %v787_v60  ;;  %v1793_v15 = vpack.c.bf16 %v862_v44, %v860_v61  ;;  %v791_v42 = vadd.f32 %v790_v56, %v2753_v52  ;;  %v864_v54 = vadd.f32 %v863_v55, %v2755_v53 }
 0x2aa   : > { %v792_v16 = vpop.f32.mrf.mxu0  ;;  %v865_v17 = vpop.f32.mrf.mxu1 }
 0x2ab   : > { %988 = vst [vmem:[#allocation2 + $0x20] sm:$0xff] %v1792_v11  ;;  %989 = vst [vmem:[#allocation2 + $0x28] sm:$0xff] %v1793_v15  ;;  %v793_v62 = vadd.f32 %v792_v16, %v2757_v51  ;;  %v866_v8 = vadd.f32 %v865_v17, %v2759_v59 }
 0x2ac   : > { %v796_v46 = vpop.f32.mrf.mxu0  ;;  %v869_v48 = vpop.f32.mrf.mxu1 }
 0x2ad   : > { %v1794_v49 = vpack.c.bf16 %v793_v62, %v791_v42  ;;  %v1795_v43 = vpack.c.bf16 %v866_v8, %v864_v54  ;;  %v797_v10 = vadd.f32 %v796_v46, %v2753_v52  ;;  %v870_v58 = vadd.f32 %v869_v48, %v2755_v53 }
 0x2ae   : > { %v798_v50 = vpop.f32.mrf.mxu0  ;;  %v871_v63 = vpop.f32.mrf.mxu1 }
 0x2af   : > { %990 = vst [vmem:[#allocation2 + $0x30] sm:$0xff] %v1794_v49  ;;  %991 = vst [vmem:[#allocation2 + $0x38] sm:$0xff] %v1795_v43  ;;  %v799_v47 = vadd.f32 %v798_v50, %v2757_v51  ;;  %v872_v57 = vadd.f32 %v871_v63, %v2759_v59 }
 0x2b0   : > { %v800_v60 = vpop.f32.mrf.mxu0  ;;  %v873_v61 = vpop.f32.mrf.mxu1 }
 0x2b1   : > { %v1796_v0 = vpack.c.bf16 %v799_v47, %v797_v10  ;;  %v1797_v44 = vpack.c.bf16 %v872_v57, %v870_v58  ;;  %v801_v11 = vadd.f32 %v800_v60, %v2753_v52  ;;  %v874_v15 = vadd.f32 %v873_v61, %v2755_v53 }
 0x2b2   : > { %v802_v56 = vpop.f32.mrf.mxu0  ;;  %v875_v55 = vpop.f32.mrf.mxu1 }
 0x2b3   : > { %992 = vst [vmem:[#allocation2 + $0x40] sm:$0xff] %v1796_v0  ;;  %993 = vst [vmem:[#allocation2 + $0x48] sm:$0xff] %v1797_v44  ;;  %v803_v16 = vadd.f32 %v802_v56, %v2757_v51  ;;  %v876_v17 = vadd.f32 %v875_v55, %v2759_v59 }
 0x2b4   : > { %v806_v42 = vpop.f32.mrf.mxu0  ;;  %v879_v54 = vpop.f32.mrf.mxu1 }
 0x2b5   : > { %v1798_v62 = vpack.c.bf16 %v803_v16, %v801_v11  ;;  %v1799_v8 = vpack.c.bf16 %v876_v17, %v874_v15  ;;  %v807_v49 = vadd.f32 %v806_v42, %v2753_v52  ;;  %v880_v43 = vadd.f32 %v879_v54, %v2755_v53 }
 0x2b6   : > { %v808_v46 = vpop.f32.mrf.mxu0  ;;  %v881_v48 = vpop.f32.mrf.mxu1  ;;  %v2798_v16 = vmov 0.0  }
 0x2b7   : > { %994 = vst [vmem:[#allocation2 + $0x50] sm:$0xff] %v1798_v62  ;;  %995 = vst [vmem:[#allocation2 + $0x58] sm:$0xff] %v1799_v8  ;;  %v809_v50 = vadd.f32 %v808_v46, %v2757_v51  ;;  %v882_v63 = vadd.f32 %v881_v48, %v2759_v59 }
 0x2b8   : > { %v810_v10 = vpop.f32.mrf.mxu0  ;;  %v883_v58 = vpop.f32.mrf.mxu1 }
 0x2b9   : > { %v1800_v47 = vpack.c.bf16 %v809_v50, %v807_v49  ;;  %v1801_v57 = vpack.c.bf16 %v882_v63, %v880_v43  ;;  %v811_v0 = vadd.f32 %v810_v10, %v2753_v52  ;;  %v884_v44 = vadd.f32 %v883_v58, %v2755_v53 }
 0x2ba   : > { %v812_v60 = vpop.f32.mrf.mxu0  ;;  %v885_v61 = vpop.f32.mrf.mxu1 }
 0x2bb   : > { %996 = vst [vmem:[#allocation2 + $0x60] sm:$0xff] %v1800_v47  ;;  %997 = vst [vmem:[#allocation2 + $0x68] sm:$0xff] %v1801_v57  ;;  %v813_v56 = vadd.f32 %v812_v60, %v2757_v51  ;;  %v886_v55 = vadd.f32 %v885_v61, %v2759_v59  ;;  %1590 = sbr.rel (%p1733_p13) target bundleno = 995 (0x3e3), region = 137 }
 0x2bd   : > { %v1802_v11 = vpack.c.bf16 %v813_v56, %v811_v0  ;;  %v1803_v15 = vpack.c.bf16 %v886_v55, %v884_v44 }
 0x2bf   : > { %998 = vst [vmem:[#allocation2 + $0x70] sm:$0xff] %v1802_v11  ;;  %999 = vst [vmem:[#allocation2 + $0x78] sm:$0xff] %v1803_v15 }
 0x2c0   : > { %v2800_v17 = vmov 0.0   ;;  %v2802_v52 = vmov 0.0  }
 0x2c1 LB: >> { %v1770_v53 = vcombine.high %v2651_v38, %v2655_v40  ;;  %v1769_v51 = vcombine.low %v2651_v38, %v2655_v40  ;;  %v1766_v59 = vcombine.high %v2643_v34, %v2647_v36  ;;  %v1772_v42 = vcombine.high %v2653_v39, %v2657_v41  ;;  %s1734_s25 = sadd.s32 4294967295, %s2573_s5  ;;  %s1739_s13 = sshll.u32 %s2308_s19, 3  ;;  %s2308_s19 = sphi %s2804_s19, %s1073_s19   ;;  %v2304_v52 = vphi %v2802_v52, %v3040_v52   ;;  %v2300_v17 = vphi %v2800_v17, %v1393_v17  }
 0x2c2   : >> { %v1771_v54 = vcombine.low %v2653_v39, %v2657_v41  ;;  %v1768_v62 = vcombine.high %v2645_v35, %v2649_v37  ;;  %v1765_v8 = vcombine.low %v2643_v34, %v2647_v36  ;;  %s1804_s15 = sshll.u32 %s2308_s19, 4  ;;  %v1762_v46 = vcombine.high %v2635_v30, %v2639_v32  ;;  %s1079_s14 = ssub.s32 %s1734_s25, %s2308_s19 }
 0x2c3   : >> { %1282 = vmatprep.subr.bf16.mxu0 %v1770_v53  ;;  %1323 = vmatprep.subr.bf16.mxu1 %v1772_v42  ;;  %v1767_v48 = vcombine.low %v2645_v35, %v2649_v37  ;;  %v1764_v49 = vcombine.high %v2637_v31, %v2641_v33  ;;  %s1740_s20 = sshll.u32 %s1079_s14, 3  ;;  %s1805_s18 = sshll.u32 %s1079_s14, 4  ;;  %v2328_v43 = vmov 0   ;;  %v1761_v50 = vcombine.low %v2635_v30, %v2639_v32 }
 0x2c4   : >> { %1283 = vmatpush1.bf16.msra.mxu0 %v1769_v51  ;;  %1324 = vmatpush1.bf16.msra.mxu1 %v1771_v54  ;;  %s1104_s16 = scalar_lea.vmem [#allocation3], %s1739_s13  ;;  %v1758_v10 = vcombine.high %v2627_v26, %v2631_v28  ;;  %v1763_v58 = vcombine.low %v2637_v31, %v2641_v33  ;;  %v1090_v47 = vsel %vm1036_vm10, 1, %v2328_v43  ;;  %v1760_v57 = vcombine.high %v2629_v27, %v2633_v29  ;;  %s2851_s22 = scalar_lea.vmem [#allocation2], %s1805_s18 }
 0x2c5   : >> { %1284 = vmatprep.subr.bf16.mxu0 %v1766_v59  ;;  %1325 = vmatprep.subr.bf16.mxu1 %v1768_v62  ;;  %v1105_v63 = vld [vmem:[%s1104_s16] sm:$0xff]  ;;  %v1094_v60 = vrot.slane %v1090_v47, %v672_v14  ;;  %s2854_s6 = scalar_lea.vmem [#allocation2], %s1804_s15  ;;  %v1757_v44 = vcombine.low %v2627_v26, %v2631_v28  ;;  %s1107_s17 = scalar_lea.vmem [#allocation3], %s1740_s20  ;;  %v1754_v55 = vcombine.high %v2619_v22, %v2623_v24 }
 0x2c6   : >> { %1314 = vmatprep.mubr.bf16.mxu0 %v2328_v43  ;;  %1355 = vmatprep.mubr.bf16.mxu1 %v2328_v43  ;;  %v1088_v61 = vld [vmem:[%s2851_s22] sm:$0xff]  ;;  %v1759_v11 = vcombine.low %v2629_v27, %v2633_v29  ;;  %v1756_v16 = vcombine.high %v2621_v23, %v2625_v25  ;;  %v1753_v51 = vcombine.low %v2619_v22, %v2623_v24  ;;  %s1073_s19 = sadd.s32 1, %s2308_s19  }
 0x2c7   : >> { %2009 = vset.pattern.permute.xlu0 %v2328_v43  ;;  %v1083_v0 = vld [vmem:[%s2854_s6] sm:$0xff]  ;;  %vm1095_vm11 = vcmp.eq.s32.totalorder %v1094_v60, 1  ;;  %v1750_v59 = vcombine.high %v2607_v18, %v2615_v20  ;;  %v1755_v42 = vcombine.low %v2621_v23, %v2625_v25  ;;  %v1752_v54 = vcombine.high %v2609_v19, %v2617_v21  ;;  %v1084_v60 = vld [vmem:[%s2854_s6 + $0x8] sm:$0xff]  ;;  %p1072_p10 = scmp.ge.s32.totalorder %s1073_s19, %s2573_s5 }
 0x2c8   : >> { %1285 = vmatpush1.bf16.msra.mxu0 %v1765_v8  ;;  %1326 = vmatpush1.bf16.msra.mxu1 %v1767_v48  ;;  %v1108_v56 = vld [vmem:[%s1107_s17] sm:$0xff]  ;;  %vm2863_vm12 = vmpackc.low %vm1095_vm11, %vm1095_vm11  ;;  %v1749_v62 = vcombine.low %v2607_v18, %v2615_v20  ;;  %v1746_v8 = vcombine.high %v2587_v5, %v2595_v12  ;;  %v1748_v48 = vcombine.high %v2589_v6, %v2597_v13 }
 0x2c9   : >> { %1286 = vmatprep.subr.bf16.mxu0 %v1762_v46  ;;  %1327 = vmatprep.subr.bf16.mxu1 %v1764_v49  ;;  %v1097_v53 = vsel %vm2863_vm12, %v1083_v0, %v1088_v61  ;;  %v1751_v46 = vcombine.low %v2609_v19, %v2617_v21  ;;  %v1745_v49 = vcombine.low %v2587_v5, %v2595_v12 }
 0x2ca   : >> { %1112 = vperm.xlu0 %2009, %v1105_v63   ;;  %v1742_v43 = vcombine.high %v2579_v1, %v2583_v3  ;;  %v1744_v63 = vcombine.high %v2581_v2, %v2585_v4  ;;  %v1121_v47 = vpack.c.bf16 %v2304_v52, %v2304_v52  ;;  %v1099_v0 = vunpack.c.l.bf16 %v1097_v53 }
 0x2cc   : >> { %1287 = vmatpush1.bf16.msra.mxu0 %v1761_v50  ;;  %1328 = vmatpush1.bf16.msra.mxu1 %v1763_v58  ;;  %v1747_v50 = vcombine.low %v2589_v6, %v2597_v13  ;;  %v1743_v58 = vcombine.low %v2581_v2, %v2585_v4 }
 0x2cd   : >> { %1288 = vmatprep.subr.bf16.mxu0 %v1758_v10  ;;  %1329 = vmatprep.subr.bf16.mxu1 %v1760_v57  ;;  %v1741_v10 = vcombine.low %v2579_v1, %v2583_v3  ;;  %v1089_v57 = vld [vmem:[%s2851_s22 + $0x8] sm:$0xff] }
 0x2ce   : >> { %1117 = vperm.xlu0 %2009, %v1108_v56   ;;  %v1098_v61 = vsel %vm2863_vm12, %v1084_v60, %v1089_v57 }
 0x2d0   : >> { %1289 = vmatpush1.bf16.msra.mxu0 %v1757_v44  ;;  %1330 = vmatpush1.bf16.msra.mxu1 %v1759_v11  ;;  %v1100_v44 = vunpack.c.h.bf16 %v1097_v53 }
 0x2d1   : >> { %1290 = vmatprep.subr.bf16.mxu0 %v1754_v55  ;;  %1331 = vmatprep.subr.bf16.mxu1 %v1756_v16 }
 0x2d4   : >> { %1291 = vmatpush1.bf16.msra.mxu0 %v1753_v51  ;;  %1332 = vmatpush1.bf16.msra.mxu1 %v1755_v42 }
 0x2d5   : >> { %1292 = vmatprep.subr.bf16.mxu0 %v1750_v59  ;;  %1333 = vmatprep.subr.bf16.mxu1 %v1752_v54 }
 0x2d8   : >> { %1293 = vmatpush1.bf16.msra.mxu0 %v1749_v62  ;;  %1334 = vmatpush1.bf16.msra.mxu1 %v1751_v46 }
 0x2d9   : >> { %1294 = vmatprep.subr.bf16.mxu0 %v1746_v8  ;;  %1335 = vmatprep.subr.bf16.mxu1 %v1748_v48 }
 0x2dc   : >> { %1295 = vmatpush1.bf16.msra.mxu0 %v1745_v49  ;;  %1336 = vmatpush1.bf16.msra.mxu1 %v1747_v50  ;;  %v1102_v49 = vunpack.c.h.bf16 %v1098_v61 }
 0x2dd   : >> { %1296 = vmatprep.subr.bf16.mxu0 %v1742_v43  ;;  %1337 = vmatprep.subr.bf16.mxu1 %v1744_v63  ;;  %v1101_v43 = vunpack.c.l.bf16 %v1098_v61 }
 0x2e0   : >> { %1297 = vmatpush1.bf16.msra.mxu0 %v1741_v10  ;;  %1338 = vmatpush1.bf16.msra.mxu1 %v1743_v58 }
 0x2e3   : >> { %1315 = vmatmul.mubr.bf16.vlgmr.msra.gmra.mxu0 %v1121_v47  ;;  %1356 = vmatmul.mubr.bf16.vlgmr.msra.gmra.mxu1 %v1121_v47 }
 0x345   : >> { %v1113_v57 = vpop.permute.xlu0 %1112 }
 0x3a3   : >> { %v1316_v56 = vpop.f32.mrf.mxu0  ;;  %v1357_v11 = vpop.f32.mrf.mxu1 }
 0x3a4   : >> { %v1317_v55 = vadd.f32 %v1316_v56, %v1099_v0  ;;  %v1358_v50 = vadd.f32 %v1357_v11, %v1101_v43 }
 0x3a5   : >> { %v1318_v16 = vpop.f32.mrf.mxu0  ;;  %v1359_v42 = vpop.f32.mrf.mxu1 }
 0x3a6   : >> { %v1773_v51 = vmul.f32 -1.442695, %v1317_v55  ;;  %v1319_v59 = vadd.f32 %v1318_v16, %v1100_v44  ;;  %v1360_v15 = vadd.f32 %v1359_v42, %v1102_v49 }
 0x3a7   : >> { %v1320_v54 = vpop.f32.mrf.mxu0  ;;  %v1361_v8 = vpop.f32.mrf.mxu1 }
 0x3a8   : >> { %2010 = vpow2.f32 %v1773_v51  ;;  %v1774_v62 = vmul.f32 -1.442695, %v1319_v59  ;;  %v1775_v63 = vmul.f32 -1.442695, %v1360_v15  ;;  %v1118_v51 = vpop.permute.xlu0 %1117 }
 0x3a9   : >> { %v1321_v46 = vpop.f32.mrf.mxu0  ;;  %v1362_v48 = vpop.f32.mrf.mxu1  ;;  %v1120_v59 = vsel %vm1036_vm10, %v1113_v57, %v1118_v51 }
 0x3aa   : >> { %2012 = vpow2.f32 %v1774_v62 }
 0x3ab   : >> { %2014 = vtanh.f32 %v1358_v50 }
 0x3ac   : >> { %2016 = vpow2.f32 %v1775_v63 }
 0x3b5   : >> { %v2011_v53 = vpop.eup %2010 }
 0x3b6   : >> { %v1367_v10 = vadd.f32 1.0, %v2011_v53 }
 0x3b7   : >> { %v2013_v58 = vpop.eup %2012 }
 0x3b8   : >> { %2018 = vrcp.f32 %v1367_v10  ;;  %v1373_v47 = vadd.f32 1.0, %v2013_v58  ;;  %v2015_v60 = vpop.eup %2014 }
 0x3b9   : >> { %v2017_v0 = vpop.eup %2016 }
 0x3ba   : >> { %2020 = vrcp.f32 %v1373_v47  ;;  %v1380_v16 = vadd.f32 1.0, %v2017_v0 }
 0x3bc   : >> { %2022 = vrcp.f32 %v1380_v16 }
 0x3c5   : >> { %v2019_v44 = vpop.eup %2018 }
 0x3c6   : >> { %v1384_v56 = vmul.f32 %v2019_v44, %v2015_v60 }
 0x3c7   : >> { %v2021_v55 = vpop.eup %2020 }
 0x3c8   : >> { %v1383_v61 = vmul.f32 %v2300_v17, %v2021_v55 }
 0x3c9   : >> { %v2023_v62 = vpop.eup %2022 }
 0x3ca   : >> { %v1385_v11 = vadd.f32 %v1384_v56, %v1383_v61 }
 0x3cc   : >> { %2024 = vtanh.f32 %v1385_v11  ;;  %v1391_v42 = vsub.f32 %v1385_v11, %v2300_v17 }
 0x3ce   : >> { %v1392_v54 = vmul.f32 %v1391_v42, %v1120_v59 }
 0x3d0   : >> { %v1393_v17 = vadd.f32 %v2300_v17, %v1392_v54  }
 0x3d9   : >> { %v2025_v8 = vpop.eup %2024 }
 0x3da   : >> { %v1387_v46 = vmul.f32 %v2025_v8, %v2023_v62 }
 0x3dc   : >> { %v1388_v48 = vsub.f32 %v1387_v46, %v2304_v52 }
 0x3de   : >> { %v1389_v49 = vmul.f32 %v1388_v48, %v1120_v59  ;;  %1075 = sbr.rel (!%p1072_p10) target bundleno = 705 (0x2c1), region = 143 }
 0x3e0   : >> { %v1390_v43 = vadd.f32 %v2304_v52, %v1389_v49  }
 0x3e2   : >> { %v3040_v52 = vmov %v1390_v43  ;;  %v3041_v16 = vmov (%p1072_p10), %v1390_v43 }
 0x3e3 PF: > { %vm1394_vm13 = vcmask 523264   ;;  %1830 = vmatprep.subr.bf16.mxu0 %v2326_v7  ;;  %v2026_v1 = vld [vmem:[%s3005_s10 + $0x18] sm:$0xff]   ;;  %vm2329_vm14 = vmmov 0   ;;  %v2027_v2 = vld [vmem:[%s3005_s10 + $0x10] sm:$0xff]   ;;  %v2028_v3 = vld [vmem:[%s3005_s10 + $0x8] sm:$0xff]   ;;  %s1785_s22 = sshll.u32 %s2420_s29, 7  ;;  %v2312_v16 = vphi %v2798_v16, %v3041_v16  }
 0x3e4   : > { %v1395_v52 = vsel %vm1394_vm13, %v2312_v16, 0.0  ;;  %1838 = vmatprep.mubr.msk.bf16.mxu0 %vm2329_vm14, %v2326_v7  ;;  %1831 = vmatpush3.bf16.msra.mxu0 %v2026_v1  ;;  %v2029_v4 = vld [vmem:[%s3005_s10] sm:$0xff]   ;;  %s1523_s6 = sshll.u32 %s2795_s8, 4  ;;  %s2951_s5 = scalar_lea.hbm %s3007_s12, %s1785_s22  ;;  %s2953_s6 = int_to_ptr.vmem [resolvable:$true] %s1523_s6 }
 0x3e5   : > { %1396 = vadd.xlane.f32.xlu0 %v1395_v52  ;;  %1832 = vmatprep.subr.bf16.mxu0 %v2326_v7  ;;  %v1776_v18 = vld [vmem:[#allocation14] ss:$0 sm:$0xff]  ;;  %v1777_v20 = vld [vmem:[#allocation15] ss:$0 sm:$0xff]  ;;  %s1510_s19 = scalar_lea.sflag [#allocation8], %s2549_s7  ;;  %s2202_s25 = scalar_lea.vmem %s2953_s6, 128 }
 0x3e6   : > { %p2203_p1 = scmp.ne.s32.totalorder %s2953_s6, %s2202_s25  ;;  %p3042_p12 = scmp.ne.s32.totalorder %s3028_s24, 0 }
 0x3e7   : > { %s2330_s29 = smov [#allocation17]  }
 0x3e8   : > { %1833 = vmatpush3.bf16.msra.mxu0 %v2027_v2  ;;  %p2204_p7 = pnand %p2203_p1, %p3042_p12  ;;  %s2206_s13 = sshll.u32 %s2330_s29, 4  ;;  %s2207_s13 = int_to_ptr.vmem [resolvable:$false] %s2206_s13 }
 0x3e9   : > { %1834 = vmatprep.subr.bf16.mxu0 %v2326_v7  ;;  %s2208_s15 = scalar_lea.vmem %s2207_s13, 256  ;;  %p2209_p8 = scmp.lt.s32.totalorder %s2953_s6, %s2207_s13 }
 0x3ea   : > { %p2205_p6 = pneg %p2204_p7  ;;  %p2210_p2 = scmp.lt.s32.totalorder %s2208_s15, %s2202_s25 }
 0x3ec   : > { %1835 = vmatpush3.bf16.msra.mxu0 %v2028_v3  ;;  %p2211_p0 = por %p2210_p2, %p2209_p8 }
 0x3ed   : > { %1836 = vmatprep.subr.bf16.mxu0 %v2326_v7  ;;  %v1778_v7 = vld [vmem:[%s3006_s11] ss:$0 sm:$0xff] }
 0x3ee   : > { %p2212_p9 = pnand %p2211_p0, %p2205_p6 }
 0x3f0   : > { %1837 = vmatpush3.bf16.msra.mxu0 %v2029_v4 }
 0x46e   : > { %v1397_v15 = vpop.xlane.xlu0 %1396 }
 0x46f   : > { %v1399_v50 = vmul.f32 0.015625, %v1397_v15 }
 0x471   : > { %v1400_v63 = vsub.f32 %v2312_v16, %v1399_v50 }
 0x473   : > { %v1401_v53 = vmul.f32 %v1400_v63, %v1400_v63 }
 0x475   : > { %v1402_v10 = vsel %vm1394_vm13, %v1401_v53, 0.0 }
 0x476   : > { %1403 = vadd.xlane.f32.xlu0 %v1402_v10 }
 0x4ff   : > { %v1404_v5 = vpop.xlane.xlu0 %1403 }
 0x500   : > { %v1405_v6 = vmul.f32 0.015625, %v1404_v5 }
 0x502   : > { %v1406_v12 = vadd.f32 1e-05, %v1405_v6 }
 0x504   : > { %2030 = vrsqrt.f32 %v1406_v12 }
 0x511   : > { %v2031_v13 = vpop.eup %2030 }
 0x512   : > { %v1408_v19 = vmul.f32 %v2031_v13, %v1400_v63 }
 0x514   : > { %v1416_v21 = vmul.f32 %v1776_v18, %v1408_v19 }
 0x516   : > { %v1424_v22 = vadd.f32 %v1777_v20, %v1416_v21 }
 0x518   : > { %v1425_v23 = vpack.c.bf16 %v1424_v22, %v1424_v22 }
 0x51a   : > { %1839 = vmatmul.mubr.msk.bf16.vlgmr.msra.gmra.mxu0 %vm1394_vm13, %v1425_v23 }
 0x5da   : > { %v1502_v24 = vpop.f32.mrf.mxu0 }
 0x5db   : > { %v1503_v25 = vadd.f32 %v1778_v7, %v1502_v24 }
 0x5dc   : > { %v1840_v26 = vpop.f32.mrf.mxu0 }
 0x5dd   : > { %1508 = vst [vmem:[%s2795_s8] sm:$0xff] %v1503_v25 }
 0x5de   : > { %v1505_v27 = vpop.f32.mrf.mxu0 }
 0x5df   : > { %2215 = shalt.err (!%p2212_p9)
}
 0x5e0   : > { %s2216_s8 = scalar_lea.hbm %s2951_s5, 128  ;;  %s2220_s20 = scalar_lea.hbm %s3007_s12, 256 }
 0x5e1   : > { %p2217_p11 = scmp.ne.s32.totalorder %s2951_s5, %s2216_s8  ;;  %p2221_p5 = scmp.lt.s32.totalorder %s2951_s5, %s3007_s12 }
 0x5e2   : > { %p2222_p13 = scmp.lt.s32.totalorder %s2220_s20, %s2216_s8 }
 0x5e3   : > { %p2218_p3 = pnand %p2217_p11, %p3042_p12 }
 0x5e4   : > { %p2223_p10 = por %p2222_p13, %p2221_p5 }
 0x5e5   : > { %p2219_p4 = pneg %p2218_p3 }
 0x5e7   : > { %p2224_p1 = pnand %p2223_p10, %p2219_p4 }
 0x5e9   : > { %2227 = shalt.err (!%p2224_p1)
}
 0x5ea   : > { %1864 = dma.vmem_to_hbm [thread:$0]  (%p3042_p12), %s2953_s6, 128, %s2951_s5, %s1510_s19   ;;  %v1841_v28 = vpop.f32.mrf.mxu0 }
 0x5eb PF: > { %s3043_s22 = sld [smem:[#allocation24_spill]]  ;;  %s1535_s17 = sand.u32 1, %s2284_s0  }
 0x5ec   : > { %p3045_p6 = scmp.ge.s32.totalorder %s2296_s28, 2  ;;  %s1536_s30 = scalar_lea.sflag [#allocation8], %s1535_s17 }
 0x5f1   : > { %p3044_p7 = scmp.ne.s32.totalorder %s3043_s22, 0 }
 0x5f3   : > { %p1887_p8 = pnand %p3045_p6, %p3044_p7 }
 0x5f5   : > { %p1888_p2 = pneg %p1887_p8 }
 0x5f7   : > { %2279 = dma.done.wait (%p1888_p2), %s1536_s30, 128  }
 0x5f8   : > { %2281 = vsyncadd (%p1888_p2), %s1536_s30, 4294967168  ;;  %p34_p0 = scmp.ge.s32.totalorder %s2494_s23, 4   ;;  %s3046_s0 = smov %s2288_s26 }
 0x5f9   : > { %s3047_s26 = smov %s2292_s27  ;;  %s3048_s27 = smov %s2504_s21 }
 0x5fa   : > { %s3049_s28 = smov %s2494_s23  ;;  %36 = sbr.rel (!%p34_p0) target bundleno = 25 (0x19), region = 154 }
 0x5ff   :  { %1541 = vsyncpa [#allocation7], 1 }
 0x600   :  { %1543 = vsyncpa [#allocation7 + $0x1], 1 }
 0x601   :  { %1544 = vsyncpa [#allocation10], 1 }
 0x602   :  { %1545 = vsyncpa [#allocation13], 1 }
 0x603   :  { %1546 = vsyncpa [#allocation16], 1 }
 0x604   :  { %1547 = vsyncpa [#allocation8], 1 }
 0x605   :  { %1549 = vsyncpa [#allocation8 + $0x1], 1 }

</bundles_post_ra>
